<compile_context>
chip_gen: v7x
topology: tpu7x:2x2x1
jax: 0.10.0
libtpu: 0.0.40
codegen_flags: <defaults>
</compile_context>

<pallas_src>
import functools

import jax
import jax.numpy as jnp
from jax.experimental import pallas as pl
from jax.experimental.pallas import tpu as pltpu

NEG_SLOPE = 0.01          # nn.LeakyReLU default negative slope
DEFAULT_TILE_B = 512      # max batch rows per grid step


# ----------------------------- helpers ---------------------------------------

def _round_up(n, m):
    return ((n + m - 1) // m) * m


def _pick_tile_b(n_batch, max_tile=DEFAULT_TILE_B):
    """Large tiles (amortize per-step overhead on v5e/v6e) but keep >= 2 grid
    steps when possible so the batch axis shards across both v7x cores."""
    n_pad = _round_up(n_batch, 8)
    if n_pad <= 8:
        return n_pad
    half = _round_up(pl.cdiv(n_pad, 2), 8)
    return min(max_tile, half)


# ------------------------------ kernel ----------------------------------------

def _linear_lrelu(h_bf16, w, b):
    # y = leaky_relu(h @ W + b); bf16 operands, f32 accumulate, bf16 out.
    z = jnp.dot(h_bf16, w, preferred_element_type=jnp.float32) + b
    return jnp.where(z >= 0, z, NEG_SLOPE * z).astype(jnp.bfloat16)


def transformer_encoder_kernel(x_ref, pe_ref,
                               w1, b1, wa, ba, wb, bb, wo, bo,
                               out_ref, *, n_blocks):
    # fan_in: W2/W3 folded into W1 at init => one (TB, nf*ni)@(nf*ni, scaled)
    # MXU dot (K=256) plus one bias add, then sigmoid (EUP) in f32.
    h = jnp.dot(x_ref[...], w1[...],
                preferred_element_type=jnp.float32) + b1[...]
    h = jax.nn.sigmoid(h)

    # positional encoding: PE rows indexed by (padded) batch position and
    # pre-tiled x nf along the feature axis, so the add stays flat/lane-dense.
    # Single cast to bf16 for the encoder matmul chain.
    h = (h + pe_ref[...]).astype(jnp.bfloat16)

    # encoder: n x LayerBlock(scaled, hs)
    # TODO(synk): LayerBlock source was not provided with the module; it is
    # implemented as a 2-layer LeakyReLU MLP (scaled -> hs -> scaled) with no
    # attention / residual / normalization.
    for i in range(n_blocks):
        h = _linear_lrelu(h, wa[i], ba[i])
        h = _linear_lrelu(h, wb[i], bb[i])

    # fan_out: Linear(scaled, hs*nf) + LeakyReLU, then F.relu.
    # relu(leaky_relu(z)) == relu(z) -> single ReLU; bf16 lane-dense store.
    z = jnp.dot(h, wo[...], preferred_element_type=jnp.float32) + bo[...]
    out_ref[...] = jnp.maximum(z, 0.0).astype(out_ref.dtype)


# --------------------------- init / positional encoding -----------------------

def _raw_linear(key, fan_in, fan_out):
    k1, k2 = jax.random.split(key)
    bound = 1.0 / float(fan_in) ** 0.5
    w = jax.random.uniform(k1, (fan_in, fan_out), jnp.float32, -bound, bound)
    b = jax.random.uniform(k2, (1, fan_out), jnp.float32, -bound, bound)
    return w, b


def init_params(key, ni, nf, hs, n=3, scale=8):
    scaled = ni * nf // scale
    keys = jax.random.split(key, 4 + 2 * n)

    # fan_in: three linears with no nonlinearity between them -> fold in f32,
    # cast once to bf16.
    w1, b1 = _raw_linear(keys[0], ni * nf, scaled)
    w2, b2 = _raw_linear(keys[1], scaled, scaled)
    w3, b3 = _raw_linear(keys[2], scaled, scaled)
    w_fused = (w1 @ w2) @ w3                       # (nf*ni, scaled) f32
    b_fused = (b1 @ w2 + b2) @ w3 + b3             # (1, scaled) f32

    wa, ba, wb, bb = [], [], [], []
    for i in range(n):
        w_a, b_a = _raw_linear(keys[3 + 2 * i], scaled, hs)
        w_b, b_b = _raw_linear(keys[4 + 2 * i], hs, scaled)
        wa.append(w_a); ba.append(b_a[0])
        wb.append(w_b); bb.append(b_b[0])

    wo, bo = _raw_linear(keys[3 + 2 * n], scaled, hs * nf)

    return {
        "w1": w_fused.astype(jnp.bfloat16),        # (nf*ni, scaled)
        "b1": b_fused,                             # (1, scaled)      f32
        "wa": jnp.stack(wa).astype(jnp.bfloat16),  # (n, scaled, hs)
        "ba": jnp.stack(ba),                       # (n, hs)          f32
        "wb": jnp.stack(wb).astype(jnp.bfloat16),  # (n, hs, scaled)
        "bb": jnp.stack(bb),                       # (n, scaled)      f32
        "wo": wo.astype(jnp.bfloat16),             # (scaled, hs*nf)
        "bo": bo,                                  # (1, hs*nf)       f32
    }


def make_positional_encoding(max_len, d_model):
    # Standard sinusoidal PE table (d_model = ni // scale).
    position = jnp.arange(max_len, dtype=jnp.float32)[:, None]
    div_term = jnp.exp(jnp.arange(0, d_model, 2, dtype=jnp.float32)
                       * (-jnp.log(10000.0) / d_model))
    pe = jnp.zeros((max_len, d_model), dtype=jnp.float32)
    pe = pe.at[:, 0::2].set(jnp.sin(position * div_term))
    pe = pe.at[:, 1::2].set(jnp.cos(position * div_term))
    return pe


def precompute_pe_tiled(n_batch, nf, d_pe, tile_b=DEFAULT_TILE_B):
    """Hoisted: batch-indexed, nf-tiled PE slab depends only on shapes."""
    tb = _pick_tile_b(n_batch, tile_b)
    n_padded = _round_up(n_batch, tb)
    pe = make_positional_encoding(n_padded, d_pe)          # (n_padded, d_pe)
    return jnp.tile(pe, (1, nf)).astype(jnp.bfloat16)      # (n_padded, nf*d_pe)


# -------------------------------- forward -------------------------------------

def transformer_encoder_forward(x, params, hs, pe_tiled,
                                tile_b=DEFAULT_TILE_B):
    nf, n_batch, ni = x.shape
    scaled = params["w1"].shape[1]
    n_blocks = params["wa"].shape[0]

    tb = _pick_tile_b(n_batch, tile_b)
    n_padded = _round_up(n_batch, tb)
    grid = (n_padded // tb,)

    # Module's transpose(0,1)+flatten(1), done once outside the kernel; bf16
    # halves the dominant HBM read stream.
    x2 = jnp.transpose(x, (1, 0, 2)).reshape(n_batch, nf * ni)
    x2 = x2.astype(jnp.bfloat16)
    if n_padded != n_batch:
        x2 = jnp.pad(x2, ((0, n_padded - n_batch), (0, 0)))
    pe = pe_tiled[:n_padded]

    weights = [params[k] for k in ("w1", "b1", "wa", "ba",
                                   "wb", "bb", "wo", "bo")]

    def resident(a):
        # Full-array block, same block index every step => stays in VMEM
        # across the whole grid (no re-DMA).
        zeros = (0,) * a.ndim
        return pl.BlockSpec(a.shape, lambda b, _z=zeros: _z)

    in_specs = ([pl.BlockSpec((tb, nf * ni), lambda b: (b, 0)),   # x tile
                 pl.BlockSpec((tb, scaled), lambda b: (b, 0))]    # PE rows
                + [resident(a) for a in weights])
    out_spec = pl.BlockSpec((tb, hs * nf), lambda b: (b, 0))      # lane-dense

    flops = 2 * n_padded * (nf * ni * scaled
                            + n_blocks * (scaled * hs + hs * scaled)
                            + scaled * hs * nf)
    bytes_accessed = (int(x2.size) * 2 + int(pe.size) * 2
                      + n_padded * hs * nf * 2
                      + sum(int(a.size) * a.dtype.itemsize for a in weights))

    kernel = functools.partial(transformer_encoder_kernel, n_blocks=n_blocks)

    out_flat = pl.pallas_call(
        kernel,
        out_shape=jax.ShapeDtypeStruct((n_padded, hs * nf), jnp.bfloat16),
        grid=grid,
        in_specs=in_specs,
        out_specs=out_spec,
        compiler_params=pltpu.CompilerParams(
            dimension_semantics=("parallel",)),
        cost_estimate=pl.CostEstimate(
            flops=int(flops),
            transcendentals=int(n_padded * scaled),       # sigmoid
            bytes_accessed=int(bytes_accessed)),
    )(x2, pe, *weights)

    # (n_padded, hs*nf) -> (nf, n_batch, hs); kept outside the kernel so the
    # in-kernel store path stays unmasked / lane-dense.
    out = out_flat[:n_batch].reshape(n_batch, nf, hs).transpose(1, 0, 2)
    return out, None


# ---------------------------------- demo --------------------------------------

if __name__ == "__main__":
    # shapes consistent with the module: ni=32, nf=8, hs=32, scale=8 -> scaled=32
    ni, nf, hs, scale, n_layers = 32, 8, 32, 8, 3
    n_batch = 256                  # two grid steps of 128 rows
    d_pe = ni // scale

    key = jax.random.PRNGKey(0)
    kx, kp = jax.random.split(key)
    x = jax.random.normal(kx, (nf, n_batch, ni), dtype=jnp.float32)
    params = init_params(kp, ni, nf, hs, n=n_layers, scale=scale)
    pe_tiled = precompute_pe_tiled(n_batch, nf, d_pe)

    fwd = jax.jit(functools.partial(transformer_encoder_forward, hs=hs))
    out, _ = fwd(x, params, pe_tiled=pe_tiled)
    out = jax.block_until_ready(out)

    assert out.shape == (nf, n_batch, hs)
    assert bool(jnp.all(jnp.isfinite(out.astype(jnp.float32))))
    print("KERNEL_OK")
</pallas_src>

<mosaic_0001>
module attributes {stable_mosaic.version = 11 : i64} {
  func.func @transformer_encoder_kernel(%arg0: i32, %arg1: memref<128x256xbf16, #tpu.memory_space<vmem>>, %arg2: memref<128x32xbf16, #tpu.memory_space<vmem>>, %arg3: memref<256x32xbf16, #tpu.memory_space<vmem>>, %arg4: memref<1x32xf32, #tpu.memory_space<vmem>>, %arg5: memref<3x32x32xbf16, #tpu.memory_space<vmem>>, %arg6: memref<3x32xf32, #tpu.memory_space<vmem>>, %arg7: memref<3x32x32xbf16, #tpu.memory_space<vmem>>, %arg8: memref<3x32xf32, #tpu.memory_space<vmem>>, %arg9: memref<32x256xbf16, #tpu.memory_space<vmem>>, %arg10: memref<1x256xf32, #tpu.memory_space<vmem>>, %arg11: memref<128x256xbf16, #tpu.memory_space<vmem>>) attributes {dimension_semantics = [#tpu.dimension_semantics<parallel>], iteration_bounds = array<i64: 2>, scalar_prefetch = 0 : i64, scratch_operands = 0 : i64, tpu.core_type = #tpu.core_type<tc>, window_params = [{transform_indices = @transform_0, window_bounds = array<i64: 128, 256>}, {transform_indices = @transform_1, window_bounds = array<i64: 128, 32>}, {pipeline_mode = #tpu.pipeline_mode<synchronous>, transform_indices = @transform_2, window_bounds = array<i64: 256, 32>}, {pipeline_mode = #tpu.pipeline_mode<synchronous>, transform_indices = @transform_3, window_bounds = array<i64: 1, 32>}, {pipeline_mode = #tpu.pipeline_mode<synchronous>, transform_indices = @transform_4, window_bounds = array<i64: 3, 32, 32>}, {pipeline_mode = #tpu.pipeline_mode<synchronous>, transform_indices = @transform_5, window_bounds = array<i64: 3, 32>}, {pipeline_mode = #tpu.pipeline_mode<synchronous>, transform_indices = @transform_6, window_bounds = array<i64: 3, 32, 32>}, {pipeline_mode = #tpu.pipeline_mode<synchronous>, transform_indices = @transform_7, window_bounds = array<i64: 3, 32>}, {pipeline_mode = #tpu.pipeline_mode<synchronous>, transform_indices = @transform_8, window_bounds = array<i64: 32, 256>}, {pipeline_mode = #tpu.pipeline_mode<synchronous>, transform_indices = @transform_9, window_bounds = array<i64: 1, 256>}, {transform_indices = @transform_10, window_bounds = array<i64: 128, 256>}]} {
    %c0 = arith.constant 0 : index
    %c0_0 = arith.constant 0 : index
    %0 = vector.load %arg1[%c0, %c0_0] : memref<128x256xbf16, #tpu.memory_space<vmem>>, vector<128x256xbf16>
    %c0_1 = arith.constant 0 : index
    %c0_2 = arith.constant 0 : index
    %1 = vector.load %arg3[%c0_1, %c0_2] : memref<256x32xbf16, #tpu.memory_space<vmem>>, vector<256x32xbf16>
    %cst = arith.constant dense<0.000000e+00> : vector<128x32xf32>
    %2 = tpu.matmul %0, %1, %cst {dimension_numbers = #tpu.dot_dimension_numbers<[1], [0], [0], [1], [0, 0, 1, 1], [], []>} : vector<128x256xbf16>, vector<256x32xbf16>, vector<128x32xf32> -> vector<128x32xf32>
    %c0_3 = arith.constant 0 : index
    %c0_4 = arith.constant 0 : index
    %3 = vector.load %arg4[%c0_3, %c0_4] : memref<1x32xf32, #tpu.memory_space<vmem>>, vector<1x32xf32>
    %4 = vector.broadcast %3 : vector<1x32xf32> to vector<128x32xf32>
    %5 = arith.addf %2, %4 : vector<128x32xf32>
    %6 = arith.negf %5 : vector<128x32xf32>
    %7 = math.exp %6 : vector<128x32xf32>
    %cst_5 = arith.constant 1.000000e+00 : f32
    %8 = vector.broadcast %cst_5 : f32 to vector<128x32xf32>
    %9 = arith.addf %8, %7 : vector<128x32xf32>
    %10 = arith.divf %8, %9 : vector<128x32xf32>
    %c0_6 = arith.constant 0 : index
    %c0_7 = arith.constant 0 : index
    %11 = vector.load %arg2[%c0_6, %c0_7] : memref<128x32xbf16, #tpu.memory_space<vmem>>, vector<128x32xbf16>
    %12 = arith.extf %11 : vector<128x32xbf16> to vector<128x32xf32>
    %13 = arith.addf %10, %12 : vector<128x32xf32>
    %14 = arith.truncf %13 : vector<128x32xf32> to vector<128x32xbf16>
    %c0_8 = arith.constant 0 : index
    %c0_9 = arith.constant 0 : index
    %c0_10 = arith.constant 0 : index
    %15 = vector.load %arg5[%c0_8, %c0_9, %c0_10] : memref<3x32x32xbf16, #tpu.memory_space<vmem>>, vector<1x32x32xbf16>
    %16 = vector.shape_cast %15 : vector<1x32x32xbf16> to vector<32x32xbf16>
    %c0_11 = arith.constant 0 : index
    %c0_12 = arith.constant 0 : index
    %17 = vector.load %arg6[%c0_11, %c0_12] : memref<3x32xf32, #tpu.memory_space<vmem>>, vector<1x32xf32>
    %18 = vector.shape_cast %17 : vector<1x32xf32> to vector<32xf32>
    %cst_13 = arith.constant dense<0.000000e+00> : vector<128x32xf32>
    %19 = tpu.matmul %14, %16, %cst_13 {dimension_numbers = #tpu.dot_dimension_numbers<[1], [0], [0], [1], [0, 0, 1, 1], [], []>} : vector<128x32xbf16>, vector<32x32xbf16>, vector<128x32xf32> -> vector<128x32xf32>
    %20 = vector.shape_cast %18 : vector<32xf32> to vector<1x32xf32>
    %21 = vector.broadcast %20 : vector<1x32xf32> to vector<128x32xf32>
    %22 = arith.addf %19, %21 : vector<128x32xf32>
    %cst_14 = arith.constant 0.000000e+00 : f32
    %23 = vector.broadcast %cst_14 : f32 to vector<128x32xf32>
    %24 = arith.cmpf oge, %22, %23 : vector<128x32xf32>
    %cst_15 = arith.constant 0.00999999977 : f32
    %25 = vector.broadcast %cst_15 : f32 to vector<128x32xf32>
    %26 = arith.mulf %25, %22 : vector<128x32xf32>
    %27 = arith.select %24, %22, %26 : vector<128x32xi1>, vector<128x32xf32>
    %28 = arith.truncf %27 : vector<128x32xf32> to vector<128x32xbf16>
    %c0_16 = arith.constant 0 : index
    %c0_17 = arith.constant 0 : index
    %c0_18 = arith.constant 0 : index
    %29 = vector.load %arg7[%c0_16, %c0_17, %c0_18] : memref<3x32x32xbf16, #tpu.memory_space<vmem>>, vector<1x32x32xbf16>
    %30 = vector.shape_cast %29 : vector<1x32x32xbf16> to vector<32x32xbf16>
    %c0_19 = arith.constant 0 : index
    %c0_20 = arith.constant 0 : index
    %31 = vector.load %arg8[%c0_19, %c0_20] : memref<3x32xf32, #tpu.memory_space<vmem>>, vector<1x32xf32>
    %32 = vector.shape_cast %31 : vector<1x32xf32> to vector<32xf32>
    %cst_21 = arith.constant dense<0.000000e+00> : vector<128x32xf32>
    %33 = tpu.matmul %28, %30, %cst_21 {dimension_numbers = #tpu.dot_dimension_numbers<[1], [0], [0], [1], [0, 0, 1, 1], [], []>} : vector<128x32xbf16>, vector<32x32xbf16>, vector<128x32xf32> -> vector<128x32xf32>
    %34 = vector.shape_cast %32 : vector<32xf32> to vector<1x32xf32>
    %35 = vector.broadcast %34 : vector<1x32xf32> to vector<128x32xf32>
    %36 = arith.addf %33, %35 : vector<128x32xf32>
    %cst_22 = arith.constant 0.000000e+00 : f32
    %37 = vector.broadcast %cst_22 : f32 to vector<128x32xf32>
    %38 = arith.cmpf oge, %36, %37 : vector<128x32xf32>
    %cst_23 = arith.constant 0.00999999977 : f32
    %39 = vector.broadcast %cst_23 : f32 to vector<128x32xf32>
    %40 = arith.mulf %39, %36 : vector<128x32xf32>
    %41 = arith.select %38, %36, %40 : vector<128x32xi1>, vector<128x32xf32>
    %42 = arith.truncf %41 : vector<128x32xf32> to vector<128x32xbf16>
    %c1 = arith.constant 1 : index
    %c0_24 = arith.constant 0 : index
    %c0_25 = arith.constant 0 : index
    %43 = vector.load %arg5[%c1, %c0_24, %c0_25] : memref<3x32x32xbf16, #tpu.memory_space<vmem>>, vector<1x32x32xbf16>
    %44 = vector.shape_cast %43 : vector<1x32x32xbf16> to vector<32x32xbf16>
    %c1_26 = arith.constant 1 : index
    %c0_27 = arith.constant 0 : index
    %45 = vector.load %arg6[%c1_26, %c0_27] : memref<3x32xf32, #tpu.memory_space<vmem>>, vector<1x32xf32>
    %46 = vector.shape_cast %45 : vector<1x32xf32> to vector<32xf32>
    %cst_28 = arith.constant dense<0.000000e+00> : vector<128x32xf32>
    %47 = tpu.matmul %42, %44, %cst_28 {dimension_numbers = #tpu.dot_dimension_numbers<[1], [0], [0], [1], [0, 0, 1, 1], [], []>} : vector<128x32xbf16>, vector<32x32xbf16>, vector<128x32xf32> -> vector<128x32xf32>
    %48 = vector.shape_cast %46 : vector<32xf32> to vector<1x32xf32>
    %49 = vector.broadcast %48 : vector<1x32xf32> to vector<128x32xf32>
    %50 = arith.addf %47, %49 : vector<128x32xf32>
    %cst_29 = arith.constant 0.000000e+00 : f32
    %51 = vector.broadcast %cst_29 : f32 to vector<128x32xf32>
    %52 = arith.cmpf oge, %50, %51 : vector<128x32xf32>
    %cst_30 = arith.constant 0.00999999977 : f32
    %53 = vector.broadcast %cst_30 : f32 to vector<128x32xf32>
    %54 = arith.mulf %53, %50 : vector<128x32xf32>
    %55 = arith.select %52, %50, %54 : vector<128x32xi1>, vector<128x32xf32>
    %56 = arith.truncf %55 : vector<128x32xf32> to vector<128x32xbf16>
    %c1_31 = arith.constant 1 : index
    %c0_32 = arith.constant 0 : index
    %c0_33 = arith.constant 0 : index
    %57 = vector.load %arg7[%c1_31, %c0_32, %c0_33] : memref<3x32x32xbf16, #tpu.memory_space<vmem>>, vector<1x32x32xbf16>
    %58 = vector.shape_cast %57 : vector<1x32x32xbf16> to vector<32x32xbf16>
    %c1_34 = arith.constant 1 : index
    %c0_35 = arith.constant 0 : index
    %59 = vector.load %arg8[%c1_34, %c0_35] : memref<3x32xf32, #tpu.memory_space<vmem>>, vector<1x32xf32>
    %60 = vector.shape_cast %59 : vector<1x32xf32> to vector<32xf32>
    %cst_36 = arith.constant dense<0.000000e+00> : vector<128x32xf32>
    %61 = tpu.matmul %56, %58, %cst_36 {dimension_numbers = #tpu.dot_dimension_numbers<[1], [0], [0], [1], [0, 0, 1, 1], [], []>} : vector<128x32xbf16>, vector<32x32xbf16>, vector<128x32xf32> -> vector<128x32xf32>
    %62 = vector.shape_cast %60 : vector<32xf32> to vector<1x32xf32>
    %63 = vector.broadcast %62 : vector<1x32xf32> to vector<128x32xf32>
    %64 = arith.addf %61, %63 : vector<128x32xf32>
    %cst_37 = arith.constant 0.000000e+00 : f32
    %65 = vector.broadcast %cst_37 : f32 to vector<128x32xf32>
    %66 = arith.cmpf oge, %64, %65 : vector<128x32xf32>
    %cst_38 = arith.constant 0.00999999977 : f32
    %67 = vector.broadcast %cst_38 : f32 to vector<128x32xf32>
    %68 = arith.mulf %67, %64 : vector<128x32xf32>
    %69 = arith.select %66, %64, %68 : vector<128x32xi1>, vector<128x32xf32>
    %70 = arith.truncf %69 : vector<128x32xf32> to vector<128x32xbf16>
    %c2 = arith.constant 2 : index
    %c0_39 = arith.constant 0 : index
    %c0_40 = arith.constant 0 : index
    %71 = vector.load %arg5[%c2, %c0_39, %c0_40] : memref<3x32x32xbf16, #tpu.memory_space<vmem>>, vector<1x32x32xbf16>
    %72 = vector.shape_cast %71 : vector<1x32x32xbf16> to vector<32x32xbf16>
    %c2_41 = arith.constant 2 : index
    %c0_42 = arith.constant 0 : index
    %73 = vector.load %arg6[%c2_41, %c0_42] : memref<3x32xf32, #tpu.memory_space<vmem>>, vector<1x32xf32>
    %74 = vector.shape_cast %73 : vector<1x32xf32> to vector<32xf32>
    %cst_43 = arith.constant dense<0.000000e+00> : vector<128x32xf32>
    %75 = tpu.matmul %70, %72, %cst_43 {dimension_numbers = #tpu.dot_dimension_numbers<[1], [0], [0], [1], [0, 0, 1, 1], [], []>} : vector<128x32xbf16>, vector<32x32xbf16>, vector<128x32xf32> -> vector<128x32xf32>
    %76 = vector.shape_cast %74 : vector<32xf32> to vector<1x32xf32>
    %77 = vector.broadcast %76 : vector<1x32xf32> to vector<128x32xf32>
    %78 = arith.addf %75, %77 : vector<128x32xf32>
    %cst_44 = arith.constant 0.000000e+00 : f32
    %79 = vector.broadcast %cst_44 : f32 to vector<128x32xf32>
    %80 = arith.cmpf oge, %78, %79 : vector<128x32xf32>
    %cst_45 = arith.constant 0.00999999977 : f32
    %81 = vector.broadcast %cst_45 : f32 to vector<128x32xf32>
    %82 = arith.mulf %81, %78 : vector<128x32xf32>
    %83 = arith.select %80, %78, %82 : vector<128x32xi1>, vector<128x32xf32>
    %84 = arith.truncf %83 : vector<128x32xf32> to vector<128x32xbf16>
    %c2_46 = arith.constant 2 : index
    %c0_47 = arith.constant 0 : index
    %c0_48 = arith.constant 0 : index
    %85 = vector.load %arg7[%c2_46, %c0_47, %c0_48] : memref<3x32x32xbf16, #tpu.memory_space<vmem>>, vector<1x32x32xbf16>
    %86 = vector.shape_cast %85 : vector<1x32x32xbf16> to vector<32x32xbf16>
    %c2_49 = arith.constant 2 : index
    %c0_50 = arith.constant 0 : index
    %87 = vector.load %arg8[%c2_49, %c0_50] : memref<3x32xf32, #tpu.memory_space<vmem>>, vector<1x32xf32>
    %88 = vector.shape_cast %87 : vector<1x32xf32> to vector<32xf32>
    %cst_51 = arith.constant dense<0.000000e+00> : vector<128x32xf32>
    %89 = tpu.matmul %84, %86, %cst_51 {dimension_numbers = #tpu.dot_dimension_numbers<[1], [0], [0], [1], [0, 0, 1, 1], [], []>} : vector<128x32xbf16>, vector<32x32xbf16>, vector<128x32xf32> -> vector<128x32xf32>
    %90 = vector.shape_cast %88 : vector<32xf32> to vector<1x32xf32>
    %91 = vector.broadcast %90 : vector<1x32xf32> to vector<128x32xf32>
    %92 = arith.addf %89, %91 : vector<128x32xf32>
    %cst_52 = arith.constant 0.000000e+00 : f32
    %93 = vector.broadcast %cst_52 : f32 to vector<128x32xf32>
    %94 = arith.cmpf oge, %92, %93 : vector<128x32xf32>
    %cst_53 = arith.constant 0.00999999977 : f32
    %95 = vector.broadcast %cst_53 : f32 to vector<128x32xf32>
    %96 = arith.mulf %95, %92 : vector<128x32xf32>
    %97 = arith.select %94, %92, %96 : vector<128x32xi1>, vector<128x32xf32>
    %98 = arith.truncf %97 : vector<128x32xf32> to vector<128x32xbf16>
    %c0_54 = arith.constant 0 : index
    %c0_55 = arith.constant 0 : index
    %99 = vector.load %arg9[%c0_54, %c0_55] : memref<32x256xbf16, #tpu.memory_space<vmem>>, vector<32x256xbf16>
    %cst_56 = arith.constant dense<0.000000e+00> : vector<128x256xf32>
    %100 = tpu.matmul %98, %99, %cst_56 {dimension_numbers = #tpu.dot_dimension_numbers<[1], [0], [0], [1], [0, 0, 1, 1], [], []>} : vector<128x32xbf16>, vector<32x256xbf16>, vector<128x256xf32> -> vector<128x256xf32>
    %c0_57 = arith.constant 0 : index
    %c0_58 = arith.constant 0 : index
    %101 = vector.load %arg10[%c0_57, %c0_58] : memref<1x256xf32, #tpu.memory_space<vmem>>, vector<1x256xf32>
    %102 = vector.broadcast %101 : vector<1x256xf32> to vector<128x256xf32>
    %103 = arith.addf %100, %102 : vector<128x256xf32>
    %cst_59 = arith.constant 0.000000e+00 : f32
    %104 = vector.broadcast %cst_59 : f32 to vector<128x256xf32>
    %105 = arith.maximumf %103, %104 : vector<128x256xf32>
    %106 = arith.truncf %105 : vector<128x256xf32> to vector<128x256xbf16>
    %c0_60 = arith.constant 0 : index
    %c0_61 = arith.constant 0 : index
    %107 = vector.load %arg11[%c0_60, %c0_61] : memref<128x256xbf16, #tpu.memory_space<vmem>>, vector<128x256xbf16>
    tpu.vector_store %arg11[%c0_60, %c0_61], %106 {strides = array<i32>} : memref<128x256xbf16, #tpu.memory_space<vmem>>, vector<128x256xbf16>,
    return
  }
  func.func @transform_0(%arg0: i32) -> (i32, i32) {
    %c0_i32 = arith.constant 0 : i32
    %c0_i32_0 = arith.constant 0 : i32
    return %arg0, %c0_i32 : i32, i32
  }
  func.func @transform_1(%arg0: i32) -> (i32, i32) {
    %c0_i32 = arith.constant 0 : i32
    %c0_i32_0 = arith.constant 0 : i32
    return %arg0, %c0_i32 : i32, i32
  }
  func.func @transform_2(%arg0: i32) -> (i32, i32) {
    %c0_i32 = arith.constant 0 : i32
    %c0_i32_0 = arith.constant 0 : i32
    %c0_i32_1 = arith.constant 0 : i32
    return %c0_i32, %c0_i32_0 : i32, i32
  }
  func.func @transform_3(%arg0: i32) -> (i32, i32) {
    %c0_i32 = arith.constant 0 : i32
    %c0_i32_0 = arith.constant 0 : i32
    %c0_i32_1 = arith.constant 0 : i32
    return %c0_i32, %c0_i32_0 : i32, i32
  }
  func.func @transform_4(%arg0: i32) -> (i32, i32, i32) {
    %c0_i32 = arith.constant 0 : i32
    %c0_i32_0 = arith.constant 0 : i32
    %c0_i32_1 = arith.constant 0 : i32
    %c0_i32_2 = arith.constant 0 : i32
    return %c0_i32, %c0_i32_0, %c0_i32_1 : i32, i32, i32
  }
  func.func @transform_5(%arg0: i32) -> (i32, i32) {
    %c0_i32 = arith.constant 0 : i32
    %c0_i32_0 = arith.constant 0 : i32
    %c0_i32_1 = arith.constant 0 : i32
    return %c0_i32, %c0_i32_0 : i32, i32
  }
  func.func @transform_6(%arg0: i32) -> (i32, i32, i32) {
    %c0_i32 = arith.constant 0 : i32
    %c0_i32_0 = arith.constant 0 : i32
    %c0_i32_1 = arith.constant 0 : i32
    %c0_i32_2 = arith.constant 0 : i32
    return %c0_i32, %c0_i32_0, %c0_i32_1 : i32, i32, i32
  }
  func.func @transform_7(%arg0: i32) -> (i32, i32) {
    %c0_i32 = arith.constant 0 : i32
    %c0_i32_0 = arith.constant 0 : i32
    %c0_i32_1 = arith.constant 0 : i32
    return %c0_i32, %c0_i32_0 : i32, i32
  }
  func.func @transform_8(%arg0: i32) -> (i32, i32) {
    %c0_i32 = arith.constant 0 : i32
    %c0_i32_0 = arith.constant 0 : i32
    %c0_i32_1 = arith.constant 0 : i32
    return %c0_i32, %c0_i32_0 : i32, i32
  }
  func.func @transform_9(%arg0: i32) -> (i32, i32) {
    %c0_i32 = arith.constant 0 : i32
    %c0_i32_0 = arith.constant 0 : i32
    %c0_i32_1 = arith.constant 0 : i32
    return %c0_i32, %c0_i32_0 : i32, i32
  }
  func.func @transform_10(%arg0: i32) -> (i32, i32) {
    %c0_i32 = arith.constant 0 : i32
    %c0_i32_0 = arith.constant 0 : i32
    return %arg0, %c0_i32 : i32, i32
  }
}

</mosaic_0001>

<bundles_post_ra>
// kernel: transformer_encoder_forward.1
= control target key start
LH: loop header
LB: loop body
LE: loop exit
PB: predicated region body
PF: predicated region fallthrough
CT: control target
= control target key end

     0   :  { %s3125_s13 = smov 0   ;;  %s3545_s0 = inlined_call_operand.vmem [shape: bf16[256,256], index: 0, kind: input, shape index: {}]   ;;  %s3546_s1 = inlined_call_operand.vmem [shape: bf16[256,32], index: 1, kind: input, shape index: {}]   ;;  %s3547_s2 = inlined_call_operand.vmem [shape: bf16[256,32], index: 2, kind: input, shape index: {}]   ;;  %s3548_s3 = inlined_call_operand.vmem [shape: f32[1,32], index: 3, kind: input, shape index: {}]   ;;  %s3549_s4 = inlined_call_operand.vmem [shape: bf16[3,32,32], index: 4, kind: input, shape index: {}]   ;;  %s3550_s5 = inlined_call_operand.vmem [shape: f32[3,32], index: 5, kind: input, shape index: {}]   ;;  %s3551_s6 = inlined_call_operand.vmem [shape: bf16[3,32,32], index: 6, kind: input, shape index: {}]   ;;  %s3552_s7 = inlined_call_operand.vmem [shape: f32[3,32], index: 7, kind: input, shape index: {}]   ;;  %s3553_s8 = inlined_call_operand.vmem [shape: bf16[32,256], index: 8, kind: input, shape index: {}]   ;;  %s3554_s9 = inlined_call_operand.vmem [shape: f32[1,256], index: 9, kind: input, shape index: {}]   ;;  %s3555_s10 = inlined_call_operand.vmem [shape: bf16[256,256], index: 10, kind: output, shape index: {}]  }
   0x1 LB: > { %s2451_s14 = sadd.s32 4294967295, %s3067_s13   ;;  %p2455_p0 = scmp.ge.s32.totalorder %s3067_s13, 1  ;;  %s3067_s13 = sphi %s3125_s13, %s20_s13  }
   0x2   : > { %p325_p1 = scmp.lt.s32.totalorder %s3067_s13, 3 }
   0x4   : > { %p326_p2 = pnand %p2455_p0, %p325_p1 }
   0x5   : > { %v2939_v0 = vld [vmem:[%s3547_s2 + $0x40] sm:$0xff] (!%p326_p2)   ;;  %s2456_s17 = sshll.u32 (!%p326_p2), %s2451_s14, 4  ;;  %v2941_v2 = vld [vmem:[%s3547_s2 + $0x48] sm:$0xff] (!%p326_p2)   ;;  %v2943_v4 = vld [vmem:[%s3547_s2 + $0x50] sm:$0xff] (!%p326_p2)   ;;  %vm892_vm0 = vcmask (!%p326_p2), 261120  }
   0x6   : > { %329 = sbr.rel (%p326_p2) target bundleno = 1910 (0x776), region = 60  ;;  %v2940_v1 = vld [vmem:[%s3547_s2] sm:$0xff] (!%p326_p2)   ;;  %2682 = vmatprep.subr.bf16.mxu0 (!%p326_p2), %v2939_v0  ;;  %v2942_v3 = vld [vmem:[%s3547_s2 + $0x8] sm:$0xff] (!%p326_p2)   ;;  %p371_p3 = scmp.lt.s32.totalorder (!%p326_p2), %s2456_s17, 31  ;;  %v2944_v5 = vld [vmem:[%s3547_s2 + $0x10] sm:$0xff] (!%p326_p2)  }
   0x7   : > { %2683 = vmatpush3.bf16.msra.mxu0 (!%p326_p2), %v2940_v1  ;;  %v2945_v6 = vld [vmem:[%s3547_s2 + $0x58] sm:$0xff] (!%p326_p2)   ;;  %v2947_v8 = vld [vmem:[%s3547_s2 + $0x60] sm:$0xff] (!%p326_p2)   ;;  %v2949_v10 = vld [vmem:[%s3547_s2 + $0x68] sm:$0xff] (!%p326_p2)  }
   0x8   : > { %2684 = vmatprep.subr.bf16.mxu0 (!%p326_p2), %v2941_v2  ;;  %v2946_v7 = vld [vmem:[%s3547_s2 + $0x18] sm:$0xff] (!%p326_p2)   ;;  %v2948_v9 = vld [vmem:[%s3547_s2 + $0x20] sm:$0xff] (!%p326_p2)   ;;  %v2950_v12 = vld [vmem:[%s3547_s2 + $0x28] sm:$0xff] (!%p326_p2)  }
   0x9   : > { %v2951_v13 = vld [vmem:[%s3547_s2 + $0x70] sm:$0xff] (!%p326_p2)   ;;  %v2953_v15 = vld [vmem:[%s3547_s2 + $0x78] sm:$0xff] (!%p326_p2)   ;;  %v2979_v17 = vld [vmem:[%s3549_s4] sm:$0xff] (!%p326_p2)  }
   0xa   : > { %v2952_v14 = vld [vmem:[%s3547_s2 + $0x30] sm:$0xff] (!%p326_p2)   ;;  %v2954_v16 = vld [vmem:[%s3547_s2 + $0x38] sm:$0xff] (!%p326_p2)   ;;  %2926 = vmatprep.subr.bf16.mxu1 (!%p326_p2), %v2979_v17  ;;  %v2980_v33 = vld [vmem:[%s3549_s4 + $0x8] sm:$0xff] (!%p326_p2)  }
   0xb   : > { %2685 = vmatpush3.bf16.msra.mxu0 (!%p326_p2), %v2942_v3  ;;  %2928 = vmatpush3.bf16.msra.mxu1 (!%p326_p2), %v2979_v17  ;;  %v3216_v35 = vld [vmem:[%s3548_s3] ss:$0 sm:$0xff] (!%p326_p2) }
   0xc   : > { %2686 = vmatprep.subr.bf16.mxu0 (!%p326_p2), %v2943_v4  ;;  %2927 = vmatprep.subr.bf16.mxu1 (!%p326_p2), %v2980_v33 }
   0xd   : > { %s3557_s17 = smov (!%p371_p3, %s2456_s17), 31 }
   0xe   : > { %s2625_s12 = sshll.u32 %s3557_s17, 3 }
   0xf   : > { %2687 = vmatpush3.bf16.msra.mxu0 %v2944_v5  ;;  %s3168_s19 = scalar_lea.vmem %s3545_s0, %s2625_s12  ;;  %2929 = vmatpush3.bf16.msra.mxu1 %v2980_v33  ;;  %s3496_s21 = scalar_lea.vmem %s3555_s10, %s2625_s12 }
  0x10   : > { %2688 = vmatprep.subr.bf16.mxu0 %v2945_v6  ;;  %v2957_v11 = vld [vmem:[%s3168_s19 + $0x4] ss:$8 sps:$4 sm:$0xff]   ;;  %v2955_v18 = vld [vmem:[%s3168_s19] ss:$8 sps:$4 sm:$0xff]   ;;  %v2958_v19 = vld [vmem:[%s3168_s19 + $0x14] ss:$8 sps:$4 sm:$0xff]  }
  0x11   : > { %654 = vmatprep.mubr.bf16.mxu0 %v2957_v11  ;;  %v2960_v20 = vld [vmem:[%s3168_s19 + $0x10] ss:$8 sps:$4 sm:$0xff]   ;;  %v2961_v21 = vld [vmem:[%s3168_s19 + $0x24] ss:$8 sps:$4 sm:$0xff]   ;;  %v2963_v22 = vld [vmem:[%s3168_s19 + $0x20] ss:$8 sps:$4 sm:$0xff]  }
  0x12   : > { %v2964_v23 = vld [vmem:[%s3168_s19 + $0x34] ss:$8 sps:$4 sm:$0xff]   ;;  %v2966_v24 = vld [vmem:[%s3168_s19 + $0x30] ss:$8 sps:$4 sm:$0xff]   ;;  %v2967_v25 = vld [vmem:[%s3168_s19 + $0x44] ss:$8 sps:$4 sm:$0xff]  }
  0x13   : > { %2689 = vmatpush3.bf16.msra.mxu0 %v2946_v7  ;;  %v2969_v26 = vld [vmem:[%s3168_s19 + $0x40] ss:$8 sps:$4 sm:$0xff]   ;;  %v2970_v27 = vld [vmem:[%s3168_s19 + $0x54] ss:$8 sps:$4 sm:$0xff]   ;;  %v2972_v28 = vld [vmem:[%s3168_s19 + $0x50] ss:$8 sps:$4 sm:$0xff]  }
  0x14   : > { %2690 = vmatprep.subr.bf16.mxu0 %v2947_v8  ;;  %v2973_v29 = vld [vmem:[%s3168_s19 + $0x64] ss:$8 sps:$4 sm:$0xff]   ;;  %v2975_v30 = vld [vmem:[%s3168_s19 + $0x60] ss:$8 sps:$4 sm:$0xff]   ;;  %v2976_v31 = vld [vmem:[%s3168_s19 + $0x74] ss:$8 sps:$4 sm:$0xff]  }
  0x15   : > { %v2978_v32 = vld [vmem:[%s3168_s19 + $0x70] ss:$8 sps:$4 sm:$0xff]   ;;  %s2460_s19 = sshll.u32 %s3557_s17, 2 }
  0x16   : > { %s3228_s26 = scalar_lea.vmem %s3546_s1, %s2460_s19 }
  0x17   : > { %2691 = vmatpush3.bf16.msra.mxu0 %v2948_v9 }
  0x18   : > { %2692 = vmatprep.subr.bf16.mxu0 %v2949_v10 }
  0x1b   : > { %2693 = vmatpush3.bf16.msra.mxu0 %v2950_v12  ;;  %v2644_v12 = vld [vmem:[%s3228_s26] sm:$0xff]  }
  0x1c   : > { %2694 = vmatprep.subr.bf16.mxu0 %v2951_v13 }
  0x1f   : > { %2695 = vmatpush3.bf16.msra.mxu0 %v2952_v14 }
  0x20   : > { %2696 = vmatprep.subr.bf16.mxu0 %v2953_v15 }
  0x23   : > { %2697 = vmatpush3.bf16.msra.mxu0 %v2954_v16 }
  0x24   : > { %2806 = vmatprep.subr.bf16.mxu0 %v2979_v17 }
  0x26   : > { %655 = vmatmul.mubr.bf16.vlgmr.msra.gmra.mrb[0].mxu0 %v2955_v18 }
  0x27   : > { %662 = vmatprep.mubr.bf16.mxu0 %v2958_v19  ;;  %2807 = vmatpush3.bf16.msra.mxu0 %v2979_v17  ;;  %v2645_v19 = vunpack.c.l.bf16 %v2644_v12 }
  0x28   : > { %2808 = vmatprep.subr.bf16.mxu0 %v2980_v33 }
  0x2b   : > { %2809 = vmatpush3.bf16.msra.mxu0 %v2980_v33 }
  0x2e   : > { %663 = vmatmul.mubr.bf16.gmra.mrb[4].mxu0 %v2960_v20  ;;  %v2646_v20 = vunpack.c.h.bf16 %v2644_v12 }
  0x2f   : > { %670 = vmatprep.mubr.bf16.mxu0 %v2961_v21 }
  0x36   : > { %671 = vmatmul.mubr.bf16.gmra.mrb[8].mxu0 %v2963_v22 }
  0x37   : > { %678 = vmatprep.mubr.bf16.mxu0 %v2964_v23 }
  0x3e   : > { %679 = vmatmul.mubr.bf16.gmra.mrb[12].mxu0 %v2966_v24 }
  0x3f   : > { %686 = vmatprep.mubr.bf16.mxu0 %v2967_v25 }
  0x46   : > { %687 = vmatmul.mubr.bf16.gmra.mrb[16].mxu0 %v2969_v26 }
  0x47   : > { %694 = vmatprep.mubr.bf16.mxu0 %v2970_v27 }
  0x4e   : > { %695 = vmatmul.mubr.bf16.gmra.mrb[20].mxu0 %v2972_v28 }
  0x4f   : > { %702 = vmatprep.mubr.bf16.mxu0 %v2973_v29 }
  0x56   : > { %703 = vmatmul.mubr.bf16.gmra.mrb[24].mxu0 %v2975_v30 }
  0x57   : > { %710 = vmatprep.mubr.bf16.mxu0 %v2976_v31  ;;  %v2675_v31 = vld [vmem:[%s3228_s26 + $0x8] sm:$0xff]  }
  0x5e   : > { %711 = vmatmul.mubr.bf16.gmra.mrb[28].mxu0 %v2978_v32 }
  0xf9   : > { %v2698_v34 = vpop.f32.mrb[0].mxu0 }
  0xfa   : > { %v2699_v36 = vpop.f32.mrb[1].mxu0 }
  0xfb   : > { %v2700_v37 = vadd.f32 %v2699_v36, %v2698_v34  ;;  %v2701_v38 = vpop.f32.mrb[2].mxu0 }
  0xfc   : > { %v2702_v39 = vpop.f32.mrb[3].mxu0 }
  0xfd   : > { %v657_v40 = vadd.f32 %v2700_v37, %v3216_v35  ;;  %v2703_v41 = vadd.f32 %v2702_v39, %v2701_v38 }
  0xff   : > { %v2497_v42 = vmul.f32 -1.442695, %v657_v40  ;;  %v660_v43 = vadd.f32 %v2703_v41, %v3216_v35  ;;  %v2649_v40 = vunpack.c.l.bf16 %v2675_v31  ;;  %v2650_v41 = vunpack.c.h.bf16 %v2675_v31 }
 0x101   : > { %2997 = vpow2.f32 %v2497_v42  ;;  %v2498_v44 = vmul.f32 -1.442695, %v660_v43  ;;  %v2704_v45 = vpop.f32.mrb[4].mxu0 }
 0x102   : > { %v2705_v46 = vpop.f32.mrb[5].mxu0 }
 0x103   : > { %2999 = vpow2.f32 %v2498_v44  ;;  %v2706_v47 = vadd.f32 %v2705_v46, %v2704_v45  ;;  %v2707_v48 = vpop.f32.mrb[6].mxu0 }
 0x104   : > { %v2708_v49 = vpop.f32.mrb[7].mxu0 }
 0x105   : > { %v665_v50 = vadd.f32 %v2706_v47, %v3216_v35  ;;  %v2709_v51 = vadd.f32 %v2708_v49, %v2707_v48 }
 0x107   : > { %v2499_v52 = vmul.f32 -1.442695, %v665_v50  ;;  %v668_v53 = vadd.f32 %v2709_v51, %v3216_v35 }
 0x109   : > { %3001 = vpow2.f32 %v2499_v52  ;;  %v2500_v54 = vmul.f32 -1.442695, %v668_v53  ;;  %v2710_v55 = vpop.f32.mrb[8].mxu0 }
 0x10a   : > { %v2711_v56 = vpop.f32.mrb[9].mxu0 }
 0x10b   : > { %v2998_v57 = vpop.eup %2997  ;;  %3003 = vpow2.f32 %v2500_v54  ;;  %v2712_v58 = vadd.f32 %v2711_v56, %v2710_v55  ;;  %v2713_v59 = vpop.f32.mrb[10].mxu0  ;;  %v2676_v56 = vld [vmem:[%s3228_s26 + $0x10] sm:$0xff]  }
 0x10c   : > { %v767_v60 = vadd.f32 1.0, %v2998_v57  ;;  %v2714_v61 = vpop.f32.mrb[11].mxu0 }
 0x10d   : > { %v3000_v62 = vpop.eup %2999  ;;  %v673_v63 = vadd.f32 %v2712_v58, %v3216_v35  ;;  %v2715_v0 = vadd.f32 %v2714_v61, %v2713_v59 }
 0x10e   : > { %3005 = vrcp.f32 %v767_v60  ;;  %v768_v1 = vadd.f32 1.0, %v3000_v62 }
 0x10f   : > { %v2501_v2 = vmul.f32 -1.442695, %v673_v63  ;;  %v676_v3 = vadd.f32 %v2715_v0, %v3216_v35  ;;  %v2653_v0 = vunpack.c.l.bf16 %v2676_v56 }
 0x110   : > { %3007 = vrcp.f32 %v768_v1  ;;  %v2654_v1 = vunpack.c.h.bf16 %v2676_v56 }
 0x111   : > { %3009 = vpow2.f32 %v2501_v2  ;;  %v2502_v4 = vmul.f32 -1.442695, %v676_v3  ;;  %v2716_v5 = vpop.f32.mrb[12].mxu0 }
 0x112   : > { %v2717_v6 = vpop.f32.mrb[13].mxu0 }
 0x113   : > { %v3002_v7 = vpop.eup %3001  ;;  %3011 = vpow2.f32 %v2502_v4  ;;  %v2718_v8 = vadd.f32 %v2717_v6, %v2716_v5  ;;  %v2719_v9 = vpop.f32.mrb[14].mxu0 }
 0x114   : > { %v769_v10 = vadd.f32 1.0, %v3002_v7  ;;  %v2720_v11 = vpop.f32.mrb[15].mxu0 }
 0x115   : > { %v3004_v13 = vpop.eup %3003  ;;  %v681_v14 = vadd.f32 %v2718_v8, %v3216_v35  ;;  %v2721_v15 = vadd.f32 %v2720_v11, %v2719_v9 }
 0x116   : > { %3013 = vrcp.f32 %v769_v10  ;;  %v770_v16 = vadd.f32 1.0, %v3004_v13 }
 0x117   : > { %v2503_v17 = vmul.f32 -1.442695, %v681_v14  ;;  %v684_v18 = vadd.f32 %v2721_v15, %v3216_v35  ;;  %v2677_v14 = vld [vmem:[%s3228_s26 + $0x18] sm:$0xff]  }
 0x118   : > { %v3006_v21 = vpop.eup %3005  ;;  %3015 = vrcp.f32 %v770_v16 }
 0x119   : > { %3017 = vpow2.f32 %v2503_v17  ;;  %v2504_v22 = vmul.f32 -1.442695, %v684_v18  ;;  %v2722_v23 = vpop.f32.mrb[16].mxu0  ;;  %v847_v29 = vadd.f32 %v3006_v21, %v2645_v19 }
 0x11a   : > { %v3008_v24 = vpop.eup %3007  ;;  %v2723_v25 = vpop.f32.mrb[17].mxu0 }
 0x11b   : > { %v3010_v26 = vpop.eup %3009  ;;  %3019 = vpow2.f32 %v2504_v22  ;;  %v2724_v27 = vadd.f32 %v2723_v25, %v2722_v23  ;;  %v2725_v28 = vpop.f32.mrb[18].mxu0  ;;  %v848_v30 = vadd.f32 %v3008_v24, %v2646_v20  ;;  %v2657_v22 = vunpack.c.l.bf16 %v2677_v14 }
 0x11c   : > { %v771_v32 = vadd.f32 1.0, %v3010_v26  ;;  %v2726_v33 = vpop.f32.mrb[19].mxu0  ;;  %v2658_v23 = vunpack.c.h.bf16 %v2677_v14 }
 0x11d   : > { %v3012_v34 = vpop.eup %3011  ;;  %v689_v36 = vadd.f32 %v2724_v27, %v3216_v35  ;;  %v2727_v37 = vadd.f32 %v2726_v33, %v2725_v28  ;;  %v863_v38 = vpack.c.bf16 %v848_v30, %v847_v29 }
 0x11e   : > { %3021 = vrcp.f32 %v771_v32  ;;  %v772_v39 = vadd.f32 1.0, %v3012_v34 }
 0x11f   : > { %v2505_v42 = vmul.f32 -1.442695, %v689_v36  ;;  %v692_v43 = vadd.f32 %v2727_v37, %v3216_v35  ;;  %2810 = vmatprep.mubr.msk.bf16.mxu0 %vm892_vm0, %v863_v38  ;;  %v2678_v37 = vld [vmem:[%s3228_s26 + $0x20] sm:$0xff]  }
 0x120   : > { %v3014_v44 = vpop.eup %3013  ;;  %3023 = vrcp.f32 %v772_v39 }
 0x121   : > { %3025 = vpow2.f32 %v2505_v42  ;;  %v2506_v45 = vmul.f32 -1.442695, %v692_v43  ;;  %v2728_v46 = vpop.f32.mrb[20].mxu0  ;;  %v849_v50 = vadd.f32 %v3014_v44, %v2649_v40 }
 0x122   : > { %v3016_v47 = vpop.eup %3015  ;;  %v2729_v48 = vpop.f32.mrb[21].mxu0 }
 0x123   : > { %v3018_v49 = vpop.eup %3017  ;;  %v850_v51 = vadd.f32 %v3016_v47, %v2650_v41  ;;  %3027 = vpow2.f32 %v2506_v45  ;;  %v2730_v52 = vadd.f32 %v2729_v48, %v2728_v46  ;;  %v2731_v53 = vpop.f32.mrb[22].mxu0  ;;  %v2661_v45 = vunpack.c.l.bf16 %v2678_v37 }
 0x124   : > { %v773_v54 = vadd.f32 1.0, %v3018_v49  ;;  %v2732_v55 = vpop.f32.mrb[23].mxu0  ;;  %v2662_v46 = vunpack.c.h.bf16 %v2678_v37 }
 0x125   : > { %v3020_v57 = vpop.eup %3019  ;;  %v697_v58 = vadd.f32 %v2730_v52, %v3216_v35  ;;  %v2733_v59 = vadd.f32 %v2732_v55, %v2731_v53  ;;  %v864_v60 = vpack.c.bf16 %v850_v51, %v849_v50 }
 0x126   : > { %3029 = vrcp.f32 %v773_v54  ;;  %v774_v61 = vadd.f32 1.0, %v3020_v57  ;;  %v2679_v54 = vld [vmem:[%s3228_s26 + $0x28] sm:$0xff]  }
 0x127   : > { %v2507_v62 = vmul.f32 -1.442695, %v697_v58  ;;  %v700_v63 = vadd.f32 %v2733_v59, %v3216_v35  ;;  %2811 = vmatmul.mubr.msk.bf16.vlgmr.msra.gmra.mrb[32].mxu0 %vm892_vm0, %v864_v60  ;;  %v2665_v57 = vunpack.c.l.bf16 %v2679_v54  ;;  %v2666_v58 = vunpack.c.h.bf16 %v2679_v54 }
 0x128   : > { %v3022_v2 = vpop.eup %3021  ;;  %3031 = vrcp.f32 %v774_v61 }
 0x129   : > { %3033 = vpow2.f32 %v2507_v62  ;;  %v2508_v3 = vmul.f32 -1.442695, %v700_v63  ;;  %v2734_v4 = vpop.f32.mrb[24].mxu0  ;;  %v851_v10 = vadd.f32 %v3022_v2, %v2653_v0 }
 0x12a   : > { %v3024_v5 = vpop.eup %3023  ;;  %v2735_v6 = vpop.f32.mrb[25].mxu0 }
 0x12b   : > { %v3026_v7 = vpop.eup %3025  ;;  %3035 = vpow2.f32 %v2508_v3  ;;  %v2736_v8 = vadd.f32 %v2735_v6, %v2734_v4  ;;  %v2737_v9 = vpop.f32.mrb[26].mxu0  ;;  %v852_v11 = vadd.f32 %v3024_v5, %v2654_v1  ;;  %v2680_v1 = vld [vmem:[%s3228_s26 + $0x30] sm:$0xff]  }
 0x12c   : > { %v775_v12 = vadd.f32 1.0, %v3026_v7  ;;  %v2738_v13 = vpop.f32.mrb[27].mxu0  ;;  %v2669_v5 = vunpack.c.l.bf16 %v2680_v1  ;;  %v2670_v6 = vunpack.c.h.bf16 %v2680_v1 }
 0x12d   : > { %v3028_v15 = vpop.eup %3027  ;;  %v705_v16 = vadd.f32 %v2736_v8, %v3216_v35  ;;  %v2739_v17 = vadd.f32 %v2738_v13, %v2737_v9  ;;  %v865_v18 = vpack.c.bf16 %v852_v11, %v851_v10  ;;  %v2681_v11 = vld [vmem:[%s3228_s26 + $0x38] sm:$0xff]  }
 0x12e   : > { %3037 = vrcp.f32 %v775_v12  ;;  %v776_v19 = vadd.f32 1.0, %v3028_v15  ;;  %v2673_v13 = vunpack.c.l.bf16 %v2681_v11  ;;  %v2674_v14 = vunpack.c.h.bf16 %v2681_v11 }
 0x12f   : > { %v2509_v20 = vmul.f32 -1.442695, %v705_v16  ;;  %v708_v21 = vadd.f32 %v2739_v17, %v3216_v35  ;;  %2814 = vmatprep.mubr.msk.bf16.mxu0 %vm892_vm0, %v865_v18 }
 0x130   : > { %v3030_v24 = vpop.eup %3029  ;;  %3039 = vrcp.f32 %v776_v19 }
 0x131   : > { %3041 = vpow2.f32 %v2509_v20  ;;  %v2510_v25 = vmul.f32 -1.442695, %v708_v21  ;;  %v2740_v26 = vpop.f32.mrb[28].mxu0  ;;  %v853_v32 = vadd.f32 %v3030_v24, %v2657_v22  ;;  %v2981_v20 = vld [vmem:[%s3551_s6] sm:$0xff]   ;;  %v2982_v21 = vld [vmem:[%s3551_s6 + $0x8] sm:$0xff]   ;;  %v2983_v22 = vld [vmem:[%s3549_s4 + $0x10] sm:$0xff]  }
 0x132   : > { %v3032_v27 = vpop.eup %3031  ;;  %v2741_v28 = vpop.f32.mrb[29].mxu0  ;;  %2826 = vmatprep.subr.bf16.mxu1 %v2981_v20 }
 0x133   : > { %v3034_v29 = vpop.eup %3033  ;;  %3043 = vpow2.f32 %v2510_v25  ;;  %v2742_v30 = vadd.f32 %v2741_v28, %v2740_v26  ;;  %v2743_v31 = vpop.f32.mrb[30].mxu0  ;;  %v854_v33 = vadd.f32 %v3032_v27, %v2658_v23  ;;  %v3268_v23 = vld [vmem:[%s3550_s5] ss:$0 sm:$0xff] }
 0x134   : > { %v777_v34 = vadd.f32 1.0, %v3034_v29  ;;  %v2744_v36 = vpop.f32.mrb[31].mxu0 }
 0x135   : > { %v3036_v38 = vpop.eup %3035  ;;  %v713_v39 = vadd.f32 %v2742_v30, %v3216_v35  ;;  %v2745_v40 = vadd.f32 %v2744_v36, %v2743_v31  ;;  %v866_v41 = vpack.c.bf16 %v854_v33, %v853_v32 }
 0x136   : > { %3045 = vrcp.f32 %v777_v34  ;;  %v778_v42 = vadd.f32 1.0, %v3036_v38 }
 0x137   : > { %v2511_v43 = vmul.f32 -1.442695, %v713_v39  ;;  %v716_v44 = vadd.f32 %v2745_v40, %v3216_v35  ;;  %2815 = vmatmul.mubr.msk.bf16.gmra.mrb[36].mxu0 %vm892_vm0, %v866_v41 }
 0x138   : > { %v3038_v47 = vpop.eup %3037  ;;  %3047 = vrcp.f32 %v778_v42 }
 0x139   : > { %3049 = vpow2.f32 %v2511_v43  ;;  %v2512_v48 = vmul.f32 -1.442695, %v716_v44  ;;  %v855_v51 = vadd.f32 %v3038_v47, %v2661_v45  ;;  %v2984_v43 = vld [vmem:[%s3549_s4 + $0x18] sm:$0xff]  }
 0x13a   : > { %v3040_v49 = vpop.eup %3039 }
 0x13b   : > { %v3042_v50 = vpop.eup %3041  ;;  %3051 = vpow2.f32 %v2512_v48  ;;  %v856_v52 = vadd.f32 %v3040_v49, %v2662_v46 }
 0x13c   : > { %v779_v53 = vadd.f32 1.0, %v3042_v50 }
 0x13d   : > { %v3044_v55 = vpop.eup %3043  ;;  %v867_v56 = vpack.c.bf16 %v856_v52, %v855_v51 }
 0x13e   : > { %3053 = vrcp.f32 %v779_v53  ;;  %v780_v35 = vadd.f32 1.0, %v3044_v55 }
 0x13f   : > { %2818 = vmatprep.mubr.msk.bf16.mxu0 %vm892_vm0, %v867_v56 }
 0x140   : > { %v3046_v59 = vpop.eup %3045  ;;  %3055 = vrcp.f32 %v780_v35 }
 0x141   : > { %v857_v62 = vadd.f32 %v3046_v59, %v2665_v57 }
 0x142   : > { %v3048_v60 = vpop.eup %3047 }
 0x143   : > { %v3050_v61 = vpop.eup %3049  ;;  %v858_v63 = vadd.f32 %v3048_v60, %v2666_v58 }
 0x144   : > { %v781_v0 = vadd.f32 1.0, %v3050_v61 }
 0x145   : > { %v3052_v2 = vpop.eup %3051  ;;  %v868_v3 = vpack.c.bf16 %v858_v63, %v857_v62 }
 0x146   : > { %3057 = vrcp.f32 %v781_v0  ;;  %v782_v4 = vadd.f32 1.0, %v3052_v2 }
 0x147   : > { %2819 = vmatmul.mubr.msk.bf16.gmra.mrb[40].mxu0 %vm892_vm0, %v868_v3 }
 0x148   : > { %v3054_v7 = vpop.eup %3053  ;;  %3059 = vrcp.f32 %v782_v4 }
 0x149   : > { %v859_v9 = vadd.f32 %v3054_v7, %v2669_v5 }
 0x14a   : > { %v3056_v8 = vpop.eup %3055 }
 0x14b   : > { %v860_v10 = vadd.f32 %v3056_v8, %v2670_v6 }
 0x14d   : > { %v869_v12 = vpack.c.bf16 %v860_v10, %v859_v9 }
 0x14f   : > { %2822 = vmatprep.mubr.msk.bf16.mxu1 %vm892_vm0, %v869_v12 }
 0x150   : > { %v3058_v15 = vpop.eup %3057 }
 0x151   : > { %v861_v17 = vadd.f32 %v3058_v15, %v2673_v13 }
 0x152   : > { %v3060_v16 = vpop.eup %3059 }
 0x153   : > { %v862_v18 = vadd.f32 %v3060_v16, %v2674_v14 }
 0x155   : > { %v870_v19 = vpack.c.bf16 %v862_v18, %v861_v17 }
 0x157   : > { %2823 = vmatmul.mubr.msk.bf16.vlgmr.msra.gmra.mrb[0].mxu1 %vm892_vm0, %v870_v19 }
 0x158   : > { %2827 = vmatpush3.bf16.msra.mxu1 %v2981_v20 }
 0x159   : > { %2828 = vmatprep.subr.bf16.mxu1 %v2982_v21 }
 0x15c   : > { %2829 = vmatpush3.bf16.msra.mxu1 %v2982_v21 }
 0x15d   : > { %2846 = vmatprep.subr.bf16.mxu1 %v2983_v22 }
 0x1fa   : > { %v2812_v24 = vpop.f32.mrb[32].mxu0 }
 0x1fb   : > { %v960_v25 = vadd.f32 %v2812_v24, %v3268_v23  ;;  %v951_v26 = vpop.f32.mrb[33].mxu0 }
 0x1fc   : > { %v952_v27 = vadd.f32 %v3268_v23, %v951_v26  ;;  %v2813_v28 = vpop.f32.mrb[34].mxu0 }
 0x1fd   : > { %v1032_v29 = vmul.f32 0.01, %v960_v25  ;;  %v963_v30 = vadd.f32 %v2813_v28, %v3268_v23  ;;  %v954_v31 = vpop.f32.mrb[35].mxu0  ;;  %vm1016_vm1 = vcmp.ge.f32.partialorder %v960_v25, 0.0 }
 0x1fe   : > { %v1030_v32 = vmul.f32 0.01, %v952_v27  ;;  %v955_v33 = vadd.f32 %v3268_v23, %v954_v31  ;;  %vm1014_vm2 = vcmp.ge.f32.partialorder %v952_v27, 0.0 }
 0x1ff   : > { %vm1017_vm3 = vcmp.ge.f32.partialorder %v963_v30, 0.0  ;;  %v1033_v34 = vmul.f32 0.01, %v963_v30  ;;  %v1048_v37 = vsel %vm1016_vm1, %v960_v25, %v1032_v29 }
 0x200   : > { %vm1015_vm4 = vcmp.ge.f32.partialorder %v955_v33, 0.0  ;;  %v1031_v36 = vmul.f32 0.01, %v955_v33  ;;  %v1046_v39 = vsel %vm1014_vm2, %v952_v27, %v1030_v32 }
 0x201   : > { %v1049_v38 = vsel %vm1017_vm3, %v963_v30, %v1033_v34  ;;  %v2985_v34 = vld [vmem:[%s3551_s6 + $0x10] sm:$0xff]  }
 0x202   : > { %v1063_v40 = vpack.c.bf16 %v1049_v38, %v1048_v37  ;;  %v1047_v41 = vsel %vm1015_vm4, %v955_v33, %v1031_v36  ;;  %2866 = vmatprep.subr.bf16.mxu0 %v2985_v34  ;;  %v3306_v36 = vld [vmem:[%s3552_s7] ss:$0 sm:$0xff] }
 0x203   : > { %v1062_v42 = vpack.c.bf16 %v1047_v41, %v1046_v39  ;;  %2867 = vmatpush3.bf16.msra.mxu0 %v2985_v34 }
 0x205   : > { %2830 = vmatprep.mubr.msk.bf16.mxu1 %vm892_vm0, %v1062_v42 }
 0x206   : > { %2831 = vmatmul.mubr.msk.bf16.vlgmr.msra.gmra.mrb[4].mxu1 %vm892_vm0, %v1063_v40 }
 0x207   : > { %2847 = vmatpush3.bf16.msra.mxu1 %v2983_v22 }
 0x208   : > { %2848 = vmatprep.subr.bf16.mxu1 %v2984_v43 }
 0x20a   : > { %v2816_v44 = vpop.f32.mrb[36].mxu0 }
 0x20b   : > { %v976_v45 = vadd.f32 %v2816_v44, %v3268_v23  ;;  %v967_v46 = vpop.f32.mrb[37].mxu0  ;;  %2849 = vmatpush3.bf16.msra.mxu1 %v2984_v43 }
 0x20c   : > { %v968_v47 = vadd.f32 %v3268_v23, %v967_v46  ;;  %v2817_v48 = vpop.f32.mrb[38].mxu0 }
 0x20d   : > { %v1036_v49 = vmul.f32 0.01, %v976_v45  ;;  %v979_v50 = vadd.f32 %v2817_v48, %v3268_v23  ;;  %v970_v51 = vpop.f32.mrb[39].mxu0  ;;  %vm1020_vm5 = vcmp.ge.f32.partialorder %v976_v45, 0.0 }
 0x20e   : > { %v1034_v52 = vmul.f32 0.01, %v968_v47  ;;  %v971_v53 = vadd.f32 %v3268_v23, %v970_v51  ;;  %vm1018_vm6 = vcmp.ge.f32.partialorder %v968_v47, 0.0 }
 0x20f   : > { %vm1021_vm7 = vcmp.ge.f32.partialorder %v979_v50, 0.0  ;;  %v1037_v54 = vmul.f32 0.01, %v979_v50  ;;  %v1052_v56 = vsel %vm1020_vm5, %v976_v45, %v1036_v49 }
 0x210   : > { %vm1019_vm8 = vcmp.ge.f32.partialorder %v971_v53, 0.0  ;;  %v1035_v55 = vmul.f32 0.01, %v971_v53  ;;  %v1050_v57 = vsel %vm1018_vm6, %v968_v47, %v1034_v52 }
 0x211   : > { %v1053_v35 = vsel %vm1021_vm7, %v979_v50, %v1037_v54 }
 0x212   : > { %v1065_v58 = vpack.c.bf16 %v1053_v35, %v1052_v56  ;;  %v1051_v59 = vsel %vm1019_vm8, %v971_v53, %v1035_v55 }
 0x213   : > { %v1064_v60 = vpack.c.bf16 %v1051_v59, %v1050_v57 }
 0x215   : > { %2834 = vmatprep.mubr.msk.bf16.mxu1 %vm892_vm0, %v1064_v60 }
 0x216   : > { %2835 = vmatmul.mubr.msk.bf16.gmra.mrb[8].mxu1 %vm892_vm0, %v1065_v58 }
 0x21a   : > { %v2820_v61 = vpop.f32.mrb[40].mxu0 }
 0x21b   : > { %v992_v62 = vadd.f32 %v2820_v61, %v3268_v23  ;;  %v983_v63 = vpop.f32.mrb[41].mxu0 }
 0x21c   : > { %v984_v0 = vadd.f32 %v3268_v23, %v983_v63  ;;  %v2821_v1 = vpop.f32.mrb[42].mxu0 }
 0x21d   : > { %v1040_v2 = vmul.f32 0.01, %v992_v62  ;;  %v995_v3 = vadd.f32 %v2821_v1, %v3268_v23  ;;  %v986_v4 = vpop.f32.mrb[43].mxu0  ;;  %vm1024_vm9 = vcmp.ge.f32.partialorder %v992_v62, 0.0 }
 0x21e   : > { %v1038_v5 = vmul.f32 0.01, %v984_v0  ;;  %v987_v6 = vadd.f32 %v3268_v23, %v986_v4  ;;  %vm1022_vm10 = vcmp.ge.f32.partialorder %v984_v0, 0.0 }
 0x21f   : > { %vm1025_vm11 = vcmp.ge.f32.partialorder %v995_v3, 0.0  ;;  %v1041_v7 = vmul.f32 0.01, %v995_v3  ;;  %v1056_v9 = vsel %vm1024_vm9, %v992_v62, %v1040_v2 }
 0x220   : > { %vm1023_vm12 = vcmp.ge.f32.partialorder %v987_v6, 0.0  ;;  %v1039_v8 = vmul.f32 0.01, %v987_v6  ;;  %v1054_v11 = vsel %vm1022_vm10, %v984_v0, %v1038_v5 }
 0x221   : > { %v1057_v10 = vsel %vm1025_vm11, %v995_v3, %v1041_v7 }
 0x222   : > { %v1067_v12 = vpack.c.bf16 %v1057_v10, %v1056_v9  ;;  %v1055_v13 = vsel %vm1023_vm12, %v987_v6, %v1039_v8 }
 0x223   : > { %v1066_v14 = vpack.c.bf16 %v1055_v13, %v1054_v11 }
 0x225   : > { %2838 = vmatprep.mubr.msk.bf16.mxu1 %vm892_vm0, %v1066_v14 }
 0x226   : > { %2839 = vmatmul.mubr.msk.bf16.gmra.mrb[12].mxu1 %vm892_vm0, %v1067_v12 }
 0x22a   : > { %v2824_v15 = vpop.f32.mrb[0].mxu1 }
 0x22b   : > { %v1008_v16 = vadd.f32 %v2824_v15, %v3268_v23  ;;  %v999_v17 = vpop.f32.mrb[1].mxu1 }
 0x22c   : > { %v1000_v18 = vadd.f32 %v3268_v23, %v999_v17  ;;  %v2825_v19 = vpop.f32.mrb[2].mxu1 }
 0x22d   : > { %v1044_v20 = vmul.f32 0.01, %v1008_v16  ;;  %v1011_v21 = vadd.f32 %v2825_v19, %v3268_v23  ;;  %v1002_v22 = vpop.f32.mrb[3].mxu1  ;;  %vm1028_vm13 = vcmp.ge.f32.partialorder %v1008_v16, 0.0 }
 0x22e   : > { %v1042_v24 = vmul.f32 0.01, %v1000_v18  ;;  %v1003_v25 = vadd.f32 %v3268_v23, %v1002_v22  ;;  %vm1026_vm14 = vcmp.ge.f32.partialorder %v1000_v18, 0.0  ;;  %v2986_v23 = vld [vmem:[%s3551_s6 + $0x18] sm:$0xff]  }
 0x22f   : > { %vm1029_vm15 = vcmp.ge.f32.partialorder %v1011_v21, 0.0  ;;  %v1045_v26 = vmul.f32 0.01, %v1011_v21  ;;  %v1060_v28 = vsel %vm1028_vm13, %v1008_v16, %v1044_v20  ;;  %2868 = vmatprep.subr.bf16.mxu0 %v2986_v23 }
 0x230   : > { %vm1027_vm1 = vcmp.ge.f32.partialorder %v1003_v25, 0.0  ;;  %v1043_v27 = vmul.f32 0.01, %v1003_v25  ;;  %v1058_v30 = vsel %vm1026_vm14, %v1000_v18, %v1042_v24  ;;  %2869 = vmatpush3.bf16.msra.mxu0 %v2986_v23 }
 0x231   : > { %v1061_v29 = vsel %vm1029_vm15, %v1011_v21, %v1045_v26 }
 0x232   : > { %v1069_v31 = vpack.c.bf16 %v1061_v29, %v1060_v28  ;;  %v1059_v32 = vsel %vm1027_vm1, %v1003_v25, %v1043_v27 }
 0x233   : > { %v1068_v33 = vpack.c.bf16 %v1059_v32, %v1058_v30 }
 0x235   : > { %2842 = vmatprep.mubr.msk.bf16.mxu1 %vm892_vm0, %v1068_v33 }
 0x236   : > { %2843 = vmatmul.mubr.msk.bf16.gmra.mrb[16].mxu1 %vm892_vm0, %v1069_v31 }
 0x2d9   : > { %v2832_v37 = vpop.f32.mrb[4].mxu1 }
 0x2da   : > { %v1158_v38 = vadd.f32 %v2832_v37, %v3306_v36  ;;  %v1149_v39 = vpop.f32.mrb[5].mxu1 }
 0x2db   : > { %v1150_v40 = vadd.f32 %v3306_v36, %v1149_v39  ;;  %v2833_v41 = vpop.f32.mrb[6].mxu1 }
 0x2dc   : > { %v1230_v42 = vmul.f32 0.01, %v1158_v38  ;;  %v1161_v43 = vadd.f32 %v2833_v41, %v3306_v36  ;;  %v1152_v44 = vpop.f32.mrb[7].mxu1  ;;  %vm1214_vm2 = vcmp.ge.f32.partialorder %v1158_v38, 0.0 }
 0x2dd   : > { %v1228_v45 = vmul.f32 0.01, %v1150_v40  ;;  %v1153_v46 = vadd.f32 %v3306_v36, %v1152_v44  ;;  %vm1212_vm3 = vcmp.ge.f32.partialorder %v1150_v40, 0.0 }
 0x2de   : > { %vm1215_vm4 = vcmp.ge.f32.partialorder %v1161_v43, 0.0  ;;  %v1231_v47 = vmul.f32 0.01, %v1161_v43  ;;  %v1246_v49 = vsel %vm1214_vm2, %v1158_v38, %v1230_v42 }
 0x2df   : > { %vm1213_vm5 = vcmp.ge.f32.partialorder %v1153_v46, 0.0  ;;  %v1229_v48 = vmul.f32 0.01, %v1153_v46  ;;  %v1244_v51 = vsel %vm1212_vm3, %v1150_v40, %v1228_v45 }
 0x2e0   : > { %v1247_v50 = vsel %vm1215_vm4, %v1161_v43, %v1231_v47  ;;  %v3341_v47 = vld [vmem:[%s3550_s5 + $0x1] ss:$0 sm:$0xff] }
 0x2e1   : > { %v1261_v52 = vpack.c.bf16 %v1247_v50, %v1246_v49  ;;  %v1245_v53 = vsel %vm1213_vm5, %v1153_v46, %v1229_v48  ;;  %v2987_v46 = vld [vmem:[%s3549_s4 + $0x20] sm:$0xff]  }
 0x2e2   : > { %v1260_v54 = vpack.c.bf16 %v1245_v53, %v1244_v51  ;;  %2886 = vmatprep.subr.bf16.mxu1 %v2987_v46 }
 0x2e4   : > { %2850 = vmatprep.mubr.msk.bf16.mxu1 %vm892_vm0, %v1260_v54 }
 0x2e5   : > { %2851 = vmatmul.mubr.msk.bf16.vlgmr.msra.gmra.mrb[20].mxu1 %vm892_vm0, %v1261_v52 }
 0x2e6   : > { %2887 = vmatpush3.bf16.msra.mxu1 %v2987_v46 }
 0x2e9   : > { %v2836_v55 = vpop.f32.mrb[8].mxu1 }
 0x2ea   : > { %v1174_v56 = vadd.f32 %v2836_v55, %v3306_v36  ;;  %v1165_v35 = vpop.f32.mrb[9].mxu1 }
 0x2eb   : > { %v1166_v57 = vadd.f32 %v3306_v36, %v1165_v35  ;;  %v2837_v58 = vpop.f32.mrb[10].mxu1 }
 0x2ec   : > { %v1234_v59 = vmul.f32 0.01, %v1174_v56  ;;  %v1177_v60 = vadd.f32 %v2837_v58, %v3306_v36  ;;  %v1168_v61 = vpop.f32.mrb[11].mxu1  ;;  %vm1218_vm6 = vcmp.ge.f32.partialorder %v1174_v56, 0.0 }
 0x2ed   : > { %v1232_v62 = vmul.f32 0.01, %v1166_v57  ;;  %v1169_v63 = vadd.f32 %v3306_v36, %v1168_v61  ;;  %vm1216_vm7 = vcmp.ge.f32.partialorder %v1166_v57, 0.0 }
 0x2ee   : > { %vm1219_vm8 = vcmp.ge.f32.partialorder %v1177_v60, 0.0  ;;  %v1235_v0 = vmul.f32 0.01, %v1177_v60  ;;  %v1250_v2 = vsel %vm1218_vm6, %v1174_v56, %v1234_v59 }
 0x2ef   : > { %vm1217_vm9 = vcmp.ge.f32.partialorder %v1169_v63, 0.0  ;;  %v1233_v1 = vmul.f32 0.01, %v1169_v63  ;;  %v1248_v4 = vsel %vm1216_vm7, %v1166_v57, %v1232_v62 }
 0x2f0   : > { %v1251_v3 = vsel %vm1219_vm8, %v1177_v60, %v1235_v0 }
 0x2f1   : > { %v1263_v5 = vpack.c.bf16 %v1251_v3, %v1250_v2  ;;  %v1249_v6 = vsel %vm1217_vm9, %v1169_v63, %v1233_v1 }
 0x2f2   : > { %v1262_v7 = vpack.c.bf16 %v1249_v6, %v1248_v4 }
 0x2f4   : > { %2854 = vmatprep.mubr.msk.bf16.mxu1 %vm892_vm0, %v1262_v7 }
 0x2f5   : > { %2855 = vmatmul.mubr.msk.bf16.gmra.mrb[24].mxu1 %vm892_vm0, %v1263_v5 }
 0x2f9   : > { %v2840_v8 = vpop.f32.mrb[12].mxu1 }
 0x2fa   : > { %v1190_v9 = vadd.f32 %v2840_v8, %v3306_v36  ;;  %v1181_v10 = vpop.f32.mrb[13].mxu1 }
 0x2fb   : > { %v1182_v11 = vadd.f32 %v3306_v36, %v1181_v10  ;;  %v2841_v12 = vpop.f32.mrb[14].mxu1 }
 0x2fc   : > { %v1238_v13 = vmul.f32 0.01, %v1190_v9  ;;  %v1193_v14 = vadd.f32 %v2841_v12, %v3306_v36  ;;  %v1184_v15 = vpop.f32.mrb[15].mxu1  ;;  %vm1222_vm10 = vcmp.ge.f32.partialorder %v1190_v9, 0.0 }
 0x2fd   : > { %v1236_v16 = vmul.f32 0.01, %v1182_v11  ;;  %v1185_v17 = vadd.f32 %v3306_v36, %v1184_v15  ;;  %vm1220_vm11 = vcmp.ge.f32.partialorder %v1182_v11, 0.0 }
 0x2fe   : > { %vm1223_vm12 = vcmp.ge.f32.partialorder %v1193_v14, 0.0  ;;  %v1239_v18 = vmul.f32 0.01, %v1193_v14  ;;  %v1254_v20 = vsel %vm1222_vm10, %v1190_v9, %v1238_v13 }
 0x2ff   : > { %vm1221_vm13 = vcmp.ge.f32.partialorder %v1185_v17, 0.0  ;;  %v1237_v19 = vmul.f32 0.01, %v1185_v17  ;;  %v1252_v22 = vsel %vm1220_vm11, %v1182_v11, %v1236_v16 }
 0x300   : > { %v1255_v21 = vsel %vm1223_vm12, %v1193_v14, %v1239_v18 }
 0x301   : > { %v1265_v24 = vpack.c.bf16 %v1255_v21, %v1254_v20  ;;  %v1253_v25 = vsel %vm1221_vm13, %v1185_v17, %v1237_v19 }
 0x302   : > { %v1264_v26 = vpack.c.bf16 %v1253_v25, %v1252_v22 }
 0x304   : > { %2858 = vmatprep.mubr.msk.bf16.mxu1 %vm892_vm0, %v1264_v26 }
 0x305   : > { %2859 = vmatmul.mubr.msk.bf16.gmra.mrb[28].mxu1 %vm892_vm0, %v1265_v24 }
 0x309   : > { %v2844_v27 = vpop.f32.mrb[16].mxu1 }
 0x30a   : > { %v1206_v28 = vadd.f32 %v2844_v27, %v3306_v36  ;;  %v1197_v29 = vpop.f32.mrb[17].mxu1 }
 0x30b   : > { %v1198_v30 = vadd.f32 %v3306_v36, %v1197_v29  ;;  %v2845_v31 = vpop.f32.mrb[18].mxu1 }
 0x30c   : > { %v1242_v32 = vmul.f32 0.01, %v1206_v28  ;;  %v1209_v33 = vadd.f32 %v2845_v31, %v3306_v36  ;;  %v1200_v34 = vpop.f32.mrb[19].mxu1  ;;  %vm1226_vm14 = vcmp.ge.f32.partialorder %v1206_v28, 0.0 }
 0x30d   : > { %v1240_v23 = vmul.f32 0.01, %v1198_v30  ;;  %v1201_v37 = vadd.f32 %v3306_v36, %v1200_v34  ;;  %vm1224_vm15 = vcmp.ge.f32.partialorder %v1198_v30, 0.0  ;;  %v2988_v36 = vld [vmem:[%s3549_s4 + $0x28] sm:$0xff]  }
 0x30e   : > { %vm1227_vm1 = vcmp.ge.f32.partialorder %v1209_v33, 0.0  ;;  %v1243_v38 = vmul.f32 0.01, %v1209_v33  ;;  %v1258_v40 = vsel %vm1226_vm14, %v1206_v28, %v1242_v32  ;;  %2888 = vmatprep.subr.bf16.mxu1 %v2988_v36 }
 0x30f   : > { %vm1225_vm2 = vcmp.ge.f32.partialorder %v1201_v37, 0.0  ;;  %v1241_v39 = vmul.f32 0.01, %v1201_v37  ;;  %v1256_v42 = vsel %vm1224_vm15, %v1198_v30, %v1240_v23  ;;  %2889 = vmatpush3.bf16.msra.mxu1 %v2988_v36 }
 0x310   : > { %v1259_v41 = vsel %vm1227_vm1, %v1209_v33, %v1243_v38 }
 0x311   : > { %v1267_v43 = vpack.c.bf16 %v1259_v41, %v1258_v40  ;;  %v1257_v44 = vsel %vm1225_vm2, %v1201_v37, %v1241_v39 }
 0x312   : > { %v1266_v45 = vpack.c.bf16 %v1257_v44, %v1256_v42 }
 0x314   : > { %2862 = vmatprep.mubr.msk.bf16.mxu1 %vm892_vm0, %v1266_v45 }
 0x315   : > { %2863 = vmatmul.mubr.msk.bf16.gmra.mrb[32].mxu1 %vm892_vm0, %v1267_v43 }
 0x3b8   : > { %v2852_v48 = vpop.f32.mrb[20].mxu1 }
 0x3b9   : > { %v1357_v49 = vadd.f32 %v2852_v48, %v3341_v47  ;;  %v1348_v50 = vpop.f32.mrb[21].mxu1 }
 0x3ba   : > { %v1349_v51 = vadd.f32 %v3341_v47, %v1348_v50  ;;  %v2853_v52 = vpop.f32.mrb[22].mxu1 }
 0x3bb   : > { %v1429_v53 = vmul.f32 0.01, %v1357_v49  ;;  %v1360_v54 = vadd.f32 %v2853_v52, %v3341_v47  ;;  %v1351_v55 = vpop.f32.mrb[23].mxu1  ;;  %vm1413_vm3 = vcmp.ge.f32.partialorder %v1357_v49, 0.0 }
 0x3bc   : > { %v1427_v56 = vmul.f32 0.01, %v1349_v51  ;;  %v1352_v35 = vadd.f32 %v3341_v47, %v1351_v55  ;;  %vm1411_vm4 = vcmp.ge.f32.partialorder %v1349_v51, 0.0 }
 0x3bd   : > { %vm1414_vm5 = vcmp.ge.f32.partialorder %v1360_v54, 0.0  ;;  %v1430_v57 = vmul.f32 0.01, %v1360_v54  ;;  %v1445_v59 = vsel %vm1413_vm3, %v1357_v49, %v1429_v53 }
 0x3be   : > { %vm1412_vm6 = vcmp.ge.f32.partialorder %v1352_v35, 0.0  ;;  %v1428_v58 = vmul.f32 0.01, %v1352_v35  ;;  %v1443_v61 = vsel %vm1411_vm4, %v1349_v51, %v1427_v56 }
 0x3bf   : > { %v1446_v60 = vsel %vm1414_vm5, %v1360_v54, %v1430_v57  ;;  %v3376_v57 = vld [vmem:[%s3552_s7 + $0x1] ss:$0 sm:$0xff] }
 0x3c0   : > { %v1460_v62 = vpack.c.bf16 %v1446_v60, %v1445_v59  ;;  %v1444_v63 = vsel %vm1412_vm6, %v1352_v35, %v1428_v58  ;;  %v2989_v35 = vld [vmem:[%s3551_s6 + $0x20] sm:$0xff]  }
 0x3c1   : > { %v1459_v0 = vpack.c.bf16 %v1444_v63, %v1443_v61  ;;  %2906 = vmatprep.subr.bf16.mxu0 %v2989_v35 }
 0x3c3   : > { %2870 = vmatprep.mubr.msk.bf16.mxu0 %vm892_vm0, %v1459_v0 }
 0x3c4   : > { %2871 = vmatmul.mubr.msk.bf16.vlgmr.msra.gmra.mrb[44].mxu0 %vm892_vm0, %v1460_v62 }
 0x3c5   : > { %2907 = vmatpush3.bf16.msra.mxu0 %v2989_v35 }
 0x3c8   : > { %v2856_v1 = vpop.f32.mrb[24].mxu1 }
 0x3c9   : > { %v1373_v2 = vadd.f32 %v2856_v1, %v3341_v47  ;;  %v1364_v3 = vpop.f32.mrb[25].mxu1 }
 0x3ca   : > { %v1365_v4 = vadd.f32 %v3341_v47, %v1364_v3  ;;  %v2857_v5 = vpop.f32.mrb[26].mxu1 }
 0x3cb   : > { %v1433_v6 = vmul.f32 0.01, %v1373_v2  ;;  %v1376_v7 = vadd.f32 %v2857_v5, %v3341_v47  ;;  %v1367_v8 = vpop.f32.mrb[27].mxu1  ;;  %vm1417_vm7 = vcmp.ge.f32.partialorder %v1373_v2, 0.0 }
 0x3cc   : > { %v1431_v9 = vmul.f32 0.01, %v1365_v4  ;;  %v1368_v10 = vadd.f32 %v3341_v47, %v1367_v8  ;;  %vm1415_vm8 = vcmp.ge.f32.partialorder %v1365_v4, 0.0 }
 0x3cd   : > { %vm1418_vm9 = vcmp.ge.f32.partialorder %v1376_v7, 0.0  ;;  %v1434_v11 = vmul.f32 0.01, %v1376_v7  ;;  %v1449_v13 = vsel %vm1417_vm7, %v1373_v2, %v1433_v6 }
 0x3ce   : > { %vm1416_vm10 = vcmp.ge.f32.partialorder %v1368_v10, 0.0  ;;  %v1432_v12 = vmul.f32 0.01, %v1368_v10  ;;  %v1447_v15 = vsel %vm1415_vm8, %v1365_v4, %v1431_v9 }
 0x3cf   : > { %v1450_v14 = vsel %vm1418_vm9, %v1376_v7, %v1434_v11 }
 0x3d0   : > { %v1462_v16 = vpack.c.bf16 %v1450_v14, %v1449_v13  ;;  %v1448_v17 = vsel %vm1416_vm10, %v1368_v10, %v1432_v12 }
 0x3d1   : > { %v1461_v18 = vpack.c.bf16 %v1448_v17, %v1447_v15 }
 0x3d3   : > { %2874 = vmatprep.mubr.msk.bf16.mxu0 %vm892_vm0, %v1461_v18 }
 0x3d4   : > { %2875 = vmatmul.mubr.msk.bf16.gmra.mrb[48].mxu0 %vm892_vm0, %v1462_v16 }
 0x3d8   : > { %v2860_v19 = vpop.f32.mrb[28].mxu1 }
 0x3d9   : > { %v1389_v20 = vadd.f32 %v2860_v19, %v3341_v47  ;;  %v1380_v21 = vpop.f32.mrb[29].mxu1 }
 0x3da   : > { %v1381_v22 = vadd.f32 %v3341_v47, %v1380_v21  ;;  %v2861_v24 = vpop.f32.mrb[30].mxu1 }
 0x3db   : > { %v1437_v25 = vmul.f32 0.01, %v1389_v20  ;;  %v1392_v26 = vadd.f32 %v2861_v24, %v3341_v47  ;;  %v1383_v27 = vpop.f32.mrb[31].mxu1  ;;  %vm1421_vm11 = vcmp.ge.f32.partialorder %v1389_v20, 0.0 }
 0x3dc   : > { %v1435_v28 = vmul.f32 0.01, %v1381_v22  ;;  %v1384_v29 = vadd.f32 %v3341_v47, %v1383_v27  ;;  %vm1419_vm12 = vcmp.ge.f32.partialorder %v1381_v22, 0.0 }
 0x3dd   : > { %vm1422_vm13 = vcmp.ge.f32.partialorder %v1392_v26, 0.0  ;;  %v1438_v30 = vmul.f32 0.01, %v1392_v26  ;;  %v1453_v32 = vsel %vm1421_vm11, %v1389_v20, %v1437_v25 }
 0x3de   : > { %vm1420_vm14 = vcmp.ge.f32.partialorder %v1384_v29, 0.0  ;;  %v1436_v31 = vmul.f32 0.01, %v1384_v29  ;;  %v1451_v34 = vsel %vm1419_vm12, %v1381_v22, %v1435_v28 }
 0x3df   : > { %v1454_v33 = vsel %vm1422_vm13, %v1392_v26, %v1438_v30 }
 0x3e0   : > { %v1464_v23 = vpack.c.bf16 %v1454_v33, %v1453_v32  ;;  %v1452_v37 = vsel %vm1420_vm14, %v1384_v29, %v1436_v31 }
 0x3e1   : > { %v1463_v38 = vpack.c.bf16 %v1452_v37, %v1451_v34 }
 0x3e3   : > { %2878 = vmatprep.mubr.msk.bf16.mxu0 %vm892_vm0, %v1463_v38 }
 0x3e4   : > { %2879 = vmatmul.mubr.msk.bf16.gmra.mrb[52].mxu0 %vm892_vm0, %v1464_v23 }
 0x3e8   : > { %v2864_v39 = vpop.f32.mrb[32].mxu1 }
 0x3e9   : > { %v1405_v40 = vadd.f32 %v2864_v39, %v3341_v47  ;;  %v1396_v41 = vpop.f32.mrb[33].mxu1 }
 0x3ea   : > { %v1397_v42 = vadd.f32 %v3341_v47, %v1396_v41  ;;  %v2865_v43 = vpop.f32.mrb[34].mxu1 }
 0x3eb   : > { %v1441_v44 = vmul.f32 0.01, %v1405_v40  ;;  %v1408_v45 = vadd.f32 %v2865_v43, %v3341_v47  ;;  %v1399_v46 = vpop.f32.mrb[35].mxu1  ;;  %vm1425_vm15 = vcmp.ge.f32.partialorder %v1405_v40, 0.0 }
 0x3ec   : > { %v1439_v36 = vmul.f32 0.01, %v1397_v42  ;;  %v1400_v48 = vadd.f32 %v3341_v47, %v1399_v46  ;;  %vm1423_vm1 = vcmp.ge.f32.partialorder %v1397_v42, 0.0  ;;  %v2990_v47 = vld [vmem:[%s3551_s6 + $0x28] sm:$0xff]  }
 0x3ed   : > { %vm1426_vm2 = vcmp.ge.f32.partialorder %v1408_v45, 0.0  ;;  %v1442_v49 = vmul.f32 0.01, %v1408_v45  ;;  %v1457_v51 = vsel %vm1425_vm15, %v1405_v40, %v1441_v44  ;;  %2908 = vmatprep.subr.bf16.mxu0 %v2990_v47 }
 0x3ee   : > { %vm1424_vm3 = vcmp.ge.f32.partialorder %v1400_v48, 0.0  ;;  %v1440_v50 = vmul.f32 0.01, %v1400_v48  ;;  %v1455_v53 = vsel %vm1423_vm1, %v1397_v42, %v1439_v36  ;;  %2909 = vmatpush3.bf16.msra.mxu0 %v2990_v47 }
 0x3ef   : > { %v1458_v52 = vsel %vm1426_vm2, %v1408_v45, %v1442_v49 }
 0x3f0   : > { %v1466_v54 = vpack.c.bf16 %v1458_v52, %v1457_v51  ;;  %v1456_v55 = vsel %vm1424_vm3, %v1400_v48, %v1440_v50 }
 0x3f1   : > { %v1465_v56 = vpack.c.bf16 %v1456_v55, %v1455_v53 }
 0x3f3   : > { %2882 = vmatprep.mubr.msk.bf16.mxu0 %vm892_vm0, %v1465_v56 }
 0x3f4   : > { %2883 = vmatmul.mubr.msk.bf16.gmra.mrb[56].mxu0 %vm892_vm0, %v1466_v54 }
 0x497   : > { %v2872_v58 = vpop.f32.mrb[44].mxu0 }
 0x498   : > { %v1556_v59 = vadd.f32 %v2872_v58, %v3376_v57  ;;  %v1547_v60 = vpop.f32.mrb[45].mxu0 }
 0x499   : > { %v1548_v61 = vadd.f32 %v3376_v57, %v1547_v60  ;;  %v2873_v62 = vpop.f32.mrb[46].mxu0 }
 0x49a   : > { %v1628_v63 = vmul.f32 0.01, %v1556_v59  ;;  %v1559_v0 = vadd.f32 %v2873_v62, %v3376_v57  ;;  %v1550_v1 = vpop.f32.mrb[47].mxu0  ;;  %vm1612_vm4 = vcmp.ge.f32.partialorder %v1556_v59, 0.0 }
 0x49b   : > { %v1626_v2 = vmul.f32 0.01, %v1548_v61  ;;  %v1551_v3 = vadd.f32 %v3376_v57, %v1550_v1  ;;  %vm1610_vm5 = vcmp.ge.f32.partialorder %v1548_v61, 0.0 }
 0x49c   : > { %vm1613_vm6 = vcmp.ge.f32.partialorder %v1559_v0, 0.0  ;;  %v1629_v4 = vmul.f32 0.01, %v1559_v0  ;;  %v1644_v6 = vsel %vm1612_vm4, %v1556_v59, %v1628_v63 }
 0x49d   : > { %vm1611_vm7 = vcmp.ge.f32.partialorder %v1551_v3, 0.0  ;;  %v1627_v5 = vmul.f32 0.01, %v1551_v3  ;;  %v1642_v8 = vsel %vm1610_vm5, %v1548_v61, %v1626_v2 }
 0x49e   : > { %v1645_v7 = vsel %vm1613_vm6, %v1559_v0, %v1629_v4  ;;  %v2996_v4 = vld [vmem:[%s3553_s8 + $0x14] ss:$8 sps:$4 sm:$0xff]  }
 0x49f   : > { %v1659_v9 = vpack.c.bf16 %v1645_v7, %v1644_v6  ;;  %v1643_v10 = vsel %vm1611_vm7, %v1551_v3, %v1627_v5  ;;  %v2991_v3 = vld [vmem:[%s3553_s8] ss:$8 sps:$4 sm:$0xff]   ;;  %v2994_v5 = vld [vmem:[%s3553_s8 + $0x10] ss:$8 sps:$4 sm:$0xff]  }
 0x4a0   : > { %v1658_v11 = vpack.c.bf16 %v1643_v10, %v1642_v8  ;;  %v3417_v6 = vld [vmem:[%s3550_s5 + $0x2] ss:$0 sm:$0xff] }
 0x4a2   : > { %2890 = vmatprep.mubr.msk.bf16.mxu1 %vm892_vm0, %v1658_v11 }
 0x4a3   : > { %2891 = vmatmul.mubr.msk.bf16.vlgmr.msra.gmra.mrb[36].mxu1 %vm892_vm0, %v1659_v9 }
 0x4a7   : > { %v2876_v12 = vpop.f32.mrb[48].mxu0 }
 0x4a8   : > { %v1572_v13 = vadd.f32 %v2876_v12, %v3376_v57  ;;  %v1563_v14 = vpop.f32.mrb[49].mxu0 }
 0x4a9   : > { %v1564_v15 = vadd.f32 %v3376_v57, %v1563_v14  ;;  %v2877_v16 = vpop.f32.mrb[50].mxu0 }
 0x4aa   : > { %v1632_v17 = vmul.f32 0.01, %v1572_v13  ;;  %v1575_v18 = vadd.f32 %v2877_v16, %v3376_v57  ;;  %v1566_v19 = vpop.f32.mrb[51].mxu0  ;;  %vm1616_vm8 = vcmp.ge.f32.partialorder %v1572_v13, 0.0 }
 0x4ab   : > { %v1630_v20 = vmul.f32 0.01, %v1564_v15  ;;  %v1567_v21 = vadd.f32 %v3376_v57, %v1566_v19  ;;  %vm1614_vm9 = vcmp.ge.f32.partialorder %v1564_v15, 0.0 }
 0x4ac   : > { %vm1617_vm10 = vcmp.ge.f32.partialorder %v1575_v18, 0.0  ;;  %v1633_v22 = vmul.f32 0.01, %v1575_v18  ;;  %v1648_v25 = vsel %vm1616_vm8, %v1572_v13, %v1632_v17 }
 0x4ad   : > { %vm1615_vm11 = vcmp.ge.f32.partialorder %v1567_v21, 0.0  ;;  %v1631_v24 = vmul.f32 0.01, %v1567_v21  ;;  %v1646_v27 = vsel %vm1614_vm9, %v1564_v15, %v1630_v20 }
 0x4ae   : > { %v1649_v26 = vsel %vm1617_vm10, %v1575_v18, %v1633_v22 }
 0x4af   : > { %v1661_v28 = vpack.c.bf16 %v1649_v26, %v1648_v25  ;;  %v1647_v29 = vsel %vm1615_vm11, %v1567_v21, %v1631_v24 }
 0x4b0   : > { %v1660_v30 = vpack.c.bf16 %v1647_v29, %v1646_v27 }
 0x4b2   : > { %2894 = vmatprep.mubr.msk.bf16.mxu1 %vm892_vm0, %v1660_v30 }
 0x4b3   : > { %2895 = vmatmul.mubr.msk.bf16.gmra.mrb[40].mxu1 %vm892_vm0, %v1661_v28 }
 0x4b7   : > { %v2880_v31 = vpop.f32.mrb[52].mxu0 }
 0x4b8   : > { %v1588_v32 = vadd.f32 %v2880_v31, %v3376_v57  ;;  %v1579_v33 = vpop.f32.mrb[53].mxu0 }
 0x4b9   : > { %v1580_v34 = vadd.f32 %v3376_v57, %v1579_v33  ;;  %v2881_v23 = vpop.f32.mrb[54].mxu0 }
 0x4ba   : > { %v1636_v37 = vmul.f32 0.01, %v1588_v32  ;;  %v1591_v38 = vadd.f32 %v2881_v23, %v3376_v57  ;;  %v1582_v39 = vpop.f32.mrb[55].mxu0  ;;  %vm1620_vm12 = vcmp.ge.f32.partialorder %v1588_v32, 0.0 }
 0x4bb   : > { %v1634_v40 = vmul.f32 0.01, %v1580_v34  ;;  %v1583_v41 = vadd.f32 %v3376_v57, %v1582_v39  ;;  %vm1618_vm13 = vcmp.ge.f32.partialorder %v1580_v34, 0.0 }
 0x4bc   : > { %vm1621_vm14 = vcmp.ge.f32.partialorder %v1591_v38, 0.0  ;;  %v1637_v42 = vmul.f32 0.01, %v1591_v38  ;;  %v1652_v44 = vsel %vm1620_vm12, %v1588_v32, %v1636_v37 }
 0x4bd   : > { %vm1619_vm15 = vcmp.ge.f32.partialorder %v1583_v41, 0.0  ;;  %v1635_v43 = vmul.f32 0.01, %v1583_v41  ;;  %v1650_v46 = vsel %vm1618_vm13, %v1580_v34, %v1634_v40 }
 0x4be   : > { %v1653_v45 = vsel %vm1621_vm14, %v1591_v38, %v1637_v42 }
 0x4bf   : > { %v1663_v36 = vpack.c.bf16 %v1653_v45, %v1652_v44  ;;  %v1651_v48 = vsel %vm1619_vm15, %v1583_v41, %v1635_v43 }
 0x4c0   : > { %v1662_v49 = vpack.c.bf16 %v1651_v48, %v1650_v46 }
 0x4c2   : > { %2898 = vmatprep.mubr.msk.bf16.mxu1 %vm892_vm0, %v1662_v49 }
 0x4c3   : > { %2899 = vmatmul.mubr.msk.bf16.gmra.mrb[44].mxu1 %vm892_vm0, %v1663_v36 }
 0x4c7   : > { %v2884_v50 = vpop.f32.mrb[56].mxu0 }
 0x4c8   : > { %v1604_v51 = vadd.f32 %v2884_v50, %v3376_v57  ;;  %v1595_v52 = vpop.f32.mrb[57].mxu0 }
 0x4c9   : > { %v1596_v53 = vadd.f32 %v3376_v57, %v1595_v52  ;;  %v2885_v54 = vpop.f32.mrb[58].mxu0 }
 0x4ca   : > { %v1640_v55 = vmul.f32 0.01, %v1604_v51  ;;  %v1607_v56 = vadd.f32 %v2885_v54, %v3376_v57  ;;  %v1598_v35 = vpop.f32.mrb[59].mxu0  ;;  %vm1624_vm1 = vcmp.ge.f32.partialorder %v1604_v51, 0.0 }
 0x4cb   : > { %v1638_v47 = vmul.f32 0.01, %v1596_v53  ;;  %v1599_v58 = vadd.f32 %v3376_v57, %v1598_v35  ;;  %vm1622_vm2 = vcmp.ge.f32.partialorder %v1596_v53, 0.0  ;;  %v2993_v57 = vld [vmem:[%s3553_s8 + $0x4] ss:$8 sps:$4 sm:$0xff]  }
 0x4cc   : > { %vm1625_vm3 = vcmp.ge.f32.partialorder %v1607_v56, 0.0  ;;  %v1641_v59 = vmul.f32 0.01, %v1607_v56  ;;  %v1656_v61 = vsel %vm1624_vm1, %v1604_v51, %v1640_v55  ;;  %2124 = vmatprep.subr.bf16.mxu1 %v2993_v57 }
 0x4cd   : > { %vm1623_vm4 = vcmp.ge.f32.partialorder %v1599_v58, 0.0  ;;  %v1639_v60 = vmul.f32 0.01, %v1599_v58  ;;  %v1654_v63 = vsel %vm1622_vm2, %v1596_v53, %v1638_v47  ;;  %2125 = vmatpush1.bf16.msra.mxu1 %v2991_v3 }
 0x4ce   : > { %v1657_v62 = vsel %vm1625_vm3, %v1607_v56, %v1641_v59  ;;  %2126 = vmatprep.subr.bf16.mxu1 %v2996_v4 }
 0x4cf   : > { %v1665_v0 = vpack.c.bf16 %v1657_v62, %v1656_v61  ;;  %v1655_v1 = vsel %vm1623_vm4, %v1599_v58, %v1639_v60 }
 0x4d0   : > { %v1664_v2 = vpack.c.bf16 %v1655_v1, %v1654_v63 }
 0x4d1   : > { %2127 = vmatpush1.bf16.msra.mxu1 %v2994_v5 }
 0x4d2   : > { %2902 = vmatprep.mubr.msk.bf16.mxu1 %vm892_vm0, %v1664_v2 }
 0x4d3   : > { %2903 = vmatmul.mubr.msk.bf16.gmra.mrb[48].mxu1 %vm892_vm0, %v1665_v0 }
 0x576   : > { %v2892_v7 = vpop.f32.mrb[36].mxu1 }
 0x577   : > { %v1755_v8 = vadd.f32 %v2892_v7, %v3417_v6  ;;  %v1746_v9 = vpop.f32.mrb[37].mxu1 }
 0x578   : > { %v1747_v10 = vadd.f32 %v3417_v6, %v1746_v9  ;;  %v2893_v11 = vpop.f32.mrb[38].mxu1 }
 0x579   : > { %v1827_v12 = vmul.f32 0.01, %v1755_v8  ;;  %v1758_v13 = vadd.f32 %v2893_v11, %v3417_v6  ;;  %v1749_v14 = vpop.f32.mrb[39].mxu1  ;;  %vm1811_vm5 = vcmp.ge.f32.partialorder %v1755_v8, 0.0 }
 0x57a   : > { %v1825_v15 = vmul.f32 0.01, %v1747_v10  ;;  %v1750_v16 = vadd.f32 %v3417_v6, %v1749_v14  ;;  %vm1809_vm6 = vcmp.ge.f32.partialorder %v1747_v10, 0.0 }
 0x57b   : > { %vm1812_vm7 = vcmp.ge.f32.partialorder %v1758_v13, 0.0  ;;  %v1828_v17 = vmul.f32 0.01, %v1758_v13  ;;  %v1843_v19 = vsel %vm1811_vm5, %v1755_v8, %v1827_v12 }
 0x57c   : > { %vm1810_vm8 = vcmp.ge.f32.partialorder %v1750_v16, 0.0  ;;  %v1826_v18 = vmul.f32 0.01, %v1750_v16  ;;  %v1841_v21 = vsel %vm1809_vm6, %v1747_v10, %v1825_v15 }
 0x57d   : > { %v1844_v20 = vsel %vm1812_vm7, %v1758_v13, %v1828_v17 }
 0x57e   : > { %v1858_v22 = vpack.c.bf16 %v1844_v20, %v1843_v19  ;;  %v1842_v24 = vsel %vm1810_vm8, %v1750_v16, %v1826_v18  ;;  %v3069_v16 = vmov 0  }
 0x57f   : > { %v1857_v25 = vpack.c.bf16 %v1842_v24, %v1841_v21  ;;  %2156 = vmatprep.mubr.bf16.mxu1 %v3069_v16 }
 0x581   : > { %2910 = vmatprep.mubr.msk.bf16.mxu0 %vm892_vm0, %v1857_v25 }
 0x582   : > { %2911 = vmatmul.mubr.msk.bf16.vlgmr.msra.gmra.mrb[60].mxu0 %vm892_vm0, %v1858_v22 }
 0x586   : > { %v2896_v26 = vpop.f32.mrb[40].mxu1 }
 0x587   : > { %v1771_v27 = vadd.f32 %v2896_v26, %v3417_v6  ;;  %v1762_v28 = vpop.f32.mrb[41].mxu1 }
 0x588   : > { %v1763_v29 = vadd.f32 %v3417_v6, %v1762_v28  ;;  %v2897_v30 = vpop.f32.mrb[42].mxu1 }
 0x589   : > { %v1831_v31 = vmul.f32 0.01, %v1771_v27  ;;  %v1774_v32 = vadd.f32 %v2897_v30, %v3417_v6  ;;  %v1765_v33 = vpop.f32.mrb[43].mxu1  ;;  %vm1815_vm9 = vcmp.ge.f32.partialorder %v1771_v27, 0.0 }
 0x58a   : > { %v1829_v34 = vmul.f32 0.01, %v1763_v29  ;;  %v1766_v23 = vadd.f32 %v3417_v6, %v1765_v33  ;;  %vm1813_vm10 = vcmp.ge.f32.partialorder %v1763_v29, 0.0 }
 0x58b   : > { %vm1816_vm11 = vcmp.ge.f32.partialorder %v1774_v32, 0.0  ;;  %v1832_v37 = vmul.f32 0.01, %v1774_v32  ;;  %v1847_v39 = vsel %vm1815_vm9, %v1771_v27, %v1831_v31 }
 0x58c   : > { %vm1814_vm12 = vcmp.ge.f32.partialorder %v1766_v23, 0.0  ;;  %v1830_v38 = vmul.f32 0.01, %v1766_v23  ;;  %v1845_v41 = vsel %vm1813_vm10, %v1763_v29, %v1829_v34 }
 0x58d   : > { %v1848_v40 = vsel %vm1816_vm11, %v1774_v32, %v1832_v37 }
 0x58e   : > { %v1860_v42 = vpack.c.bf16 %v1848_v40, %v1847_v39  ;;  %v1846_v43 = vsel %vm1814_vm12, %v1766_v23, %v1830_v38 }
 0x58f   : > { %v1859_v44 = vpack.c.bf16 %v1846_v43, %v1845_v41 }
 0x591   : > { %2914 = vmatprep.mubr.msk.bf16.mxu0 %vm892_vm0, %v1859_v44 }
 0x592   : > { %2915 = vmatmul.mubr.msk.bf16.gmra.mrb[64].mxu0 %vm892_vm0, %v1860_v42 }
 0x596   : > { %v2900_v45 = vpop.f32.mrb[44].mxu1 }
 0x597   : > { %v1787_v46 = vadd.f32 %v2900_v45, %v3417_v6  ;;  %v1778_v36 = vpop.f32.mrb[45].mxu1 }
 0x598   : > { %v1779_v48 = vadd.f32 %v3417_v6, %v1778_v36  ;;  %v2901_v49 = vpop.f32.mrb[46].mxu1 }
 0x599   : > { %v1835_v50 = vmul.f32 0.01, %v1787_v46  ;;  %v1790_v51 = vadd.f32 %v2901_v49, %v3417_v6  ;;  %v1781_v52 = vpop.f32.mrb[47].mxu1  ;;  %vm1819_vm13 = vcmp.ge.f32.partialorder %v1787_v46, 0.0 }
 0x59a   : > { %v1833_v53 = vmul.f32 0.01, %v1779_v48  ;;  %v1782_v54 = vadd.f32 %v3417_v6, %v1781_v52  ;;  %vm1817_vm14 = vcmp.ge.f32.partialorder %v1779_v48, 0.0 }
 0x59b   : > { %vm1820_vm15 = vcmp.ge.f32.partialorder %v1790_v51, 0.0  ;;  %v1836_v55 = vmul.f32 0.01, %v1790_v51  ;;  %v1851_v35 = vsel %vm1819_vm13, %v1787_v46, %v1835_v50 }
 0x59c   : > { %vm1818_vm1 = vcmp.ge.f32.partialorder %v1782_v54, 0.0  ;;  %v1834_v56 = vmul.f32 0.01, %v1782_v54  ;;  %v1849_v58 = vsel %vm1817_vm14, %v1779_v48, %v1833_v53 }
 0x59d   : > { %v1852_v47 = vsel %vm1820_vm15, %v1790_v51, %v1836_v55 }
 0x59e   : > { %v1862_v59 = vpack.c.bf16 %v1852_v47, %v1851_v35  ;;  %v1850_v60 = vsel %vm1818_vm1, %v1782_v54, %v1834_v56 }
 0x59f   : > { %v1861_v61 = vpack.c.bf16 %v1850_v60, %v1849_v58 }
 0x5a1   : > { %2918 = vmatprep.mubr.msk.bf16.mxu0 %vm892_vm0, %v1861_v61 }
 0x5a2   : > { %2919 = vmatmul.mubr.msk.bf16.gmra.mrb[68].mxu0 %vm892_vm0, %v1862_v59 }
 0x5a6   : > { %v2904_v62 = vpop.f32.mrb[48].mxu1 }
 0x5a7   : > { %v1803_v63 = vadd.f32 %v2904_v62, %v3417_v6  ;;  %v1794_v0 = vpop.f32.mrb[49].mxu1 }
 0x5a8   : > { %v1795_v1 = vadd.f32 %v3417_v6, %v1794_v0  ;;  %v2905_v2 = vpop.f32.mrb[50].mxu1 }
 0x5a9   : > { %v1839_v3 = vmul.f32 0.01, %v1803_v63  ;;  %v1806_v57 = vadd.f32 %v2905_v2, %v3417_v6  ;;  %v1797_v4 = vpop.f32.mrb[51].mxu1  ;;  %vm1823_vm2 = vcmp.ge.f32.partialorder %v1803_v63, 0.0 }
 0x5aa   : > { %v1837_v5 = vmul.f32 0.01, %v1795_v1  ;;  %v1798_v7 = vadd.f32 %v3417_v6, %v1797_v4  ;;  %vm1821_vm3 = vcmp.ge.f32.partialorder %v1795_v1, 0.0  ;;  %v3447_v6 = vld [vmem:[%s3552_s7 + $0x2] ss:$0 sm:$0xff] }
 0x5ab   : > { %vm1824_vm4 = vcmp.ge.f32.partialorder %v1806_v57, 0.0  ;;  %v1840_v8 = vmul.f32 0.01, %v1806_v57  ;;  %v1855_v10 = vsel %vm1823_vm2, %v1803_v63, %v1839_v3 }
 0x5ac   : > { %vm1822_vm5 = vcmp.ge.f32.partialorder %v1798_v7, 0.0  ;;  %v1838_v9 = vmul.f32 0.01, %v1798_v7  ;;  %v1853_v12 = vsel %vm1821_vm3, %v1795_v1, %v1837_v5 }
 0x5ad   : > { %v1856_v11 = vsel %vm1824_vm4, %v1806_v57, %v1840_v8 }
 0x5ae   : > { %v1864_v13 = vpack.c.bf16 %v1856_v11, %v1855_v10  ;;  %v1854_v14 = vsel %vm1822_vm5, %v1798_v7, %v1838_v9 }
 0x5af   : > { %v1863_v15 = vpack.c.bf16 %v1854_v14, %v1853_v12 }
 0x5b1   : > { %2922 = vmatprep.mubr.msk.bf16.mxu0 %vm892_vm0, %v1863_v15 }
 0x5b2   : > { %2923 = vmatmul.mubr.msk.bf16.gmra.mrb[72].mxu0 %vm892_vm0, %v1864_v13 }
 0x655   : > { %v2912_v17 = vpop.f32.mrb[60].mxu0 }
 0x656   : > { %v1954_v18 = vadd.f32 %v2912_v17, %v3447_v6  ;;  %v1945_v19 = vpop.f32.mrb[61].mxu0 }
 0x657   : > { %v1946_v20 = vadd.f32 %v3447_v6, %v1945_v19  ;;  %v2913_v21 = vpop.f32.mrb[62].mxu0 }
 0x658   : > { %v2026_v22 = vmul.f32 0.01, %v1954_v18  ;;  %v1957_v24 = vadd.f32 %v2913_v21, %v3447_v6  ;;  %v1948_v25 = vpop.f32.mrb[63].mxu0  ;;  %vm2010_vm6 = vcmp.ge.f32.partialorder %v1954_v18, 0.0 }
 0x659   : > { %v2024_v26 = vmul.f32 0.01, %v1946_v20  ;;  %v1949_v27 = vadd.f32 %v3447_v6, %v1948_v25  ;;  %vm2008_vm7 = vcmp.ge.f32.partialorder %v1946_v20, 0.0 }
 0x65a   : > { %vm2011_vm8 = vcmp.ge.f32.partialorder %v1957_v24, 0.0  ;;  %v2027_v28 = vmul.f32 0.01, %v1957_v24  ;;  %v2042_v30 = vsel %vm2010_vm6, %v1954_v18, %v2026_v22 }
 0x65b   : > { %vm2009_vm9 = vcmp.ge.f32.partialorder %v1949_v27, 0.0  ;;  %v2025_v29 = vmul.f32 0.01, %v1949_v27  ;;  %v2040_v32 = vsel %vm2008_vm7, %v1946_v20, %v2024_v26 }
 0x65c   : > { %v2043_v31 = vsel %vm2011_vm8, %v1957_v24, %v2027_v28 }
 0x65d   : > { %v2057_v33 = vpack.c.bf16 %v2043_v31, %v2042_v30  ;;  %v2041_v34 = vsel %vm2009_vm9, %v1949_v27, %v2025_v29  ;;  %v2068_v30 = vld [vmem:[%s3554_s9] sm:$0x3] }
 0x65e   : > { %v2056_v23 = vpack.c.bf16 %v2041_v34, %v2040_v32 }
 0x660   : > { %2599 = vmatmul.mubr.msk.bf16.vlgmr.msra.gmra.mrb[52].mxu1 %vm892_vm0, %v2056_v23 }
 0x661   : > { %2166 = vmatprep.mubr.bf16.mxu1 %v3069_v16 }
 0x665   : > { %v2916_v37 = vpop.f32.mrb[64].mxu0 }
 0x666   : > { %v1970_v38 = vadd.f32 %v2916_v37, %v3447_v6  ;;  %v1961_v39 = vpop.f32.mrb[65].mxu0 }
 0x667   : > { %v1962_v40 = vadd.f32 %v3447_v6, %v1961_v39  ;;  %v2917_v41 = vpop.f32.mrb[66].mxu0 }
 0x668   : > { %v2030_v42 = vmul.f32 0.01, %v1970_v38  ;;  %v1973_v43 = vadd.f32 %v2917_v41, %v3447_v6  ;;  %v1964_v44 = vpop.f32.mrb[67].mxu0  ;;  %2600 = vmatmul.mubr.msk.bf16.gmra.mrb[56].mxu1 %vm892_vm0, %v2057_v33  ;;  %vm2014_vm10 = vcmp.ge.f32.partialorder %v1970_v38, 0.0 }
 0x669   : > { %v2028_v45 = vmul.f32 0.01, %v1962_v40  ;;  %v1965_v46 = vadd.f32 %v3447_v6, %v1964_v44  ;;  %2176 = vmatprep.mubr.bf16.mxu1 %v3069_v16  ;;  %vm2012_vm11 = vcmp.ge.f32.partialorder %v1962_v40, 0.0 }
 0x66a   : > { %vm2015_vm12 = vcmp.ge.f32.partialorder %v1973_v43, 0.0  ;;  %v2031_v36 = vmul.f32 0.01, %v1973_v43  ;;  %v2046_v49 = vsel %vm2014_vm10, %v1970_v38, %v2030_v42 }
 0x66b   : > { %vm2013_vm13 = vcmp.ge.f32.partialorder %v1965_v46, 0.0  ;;  %v2029_v48 = vmul.f32 0.01, %v1965_v46  ;;  %v2044_v51 = vsel %vm2012_vm11, %v1962_v40, %v2028_v45 }
 0x66c   : > { %v2047_v50 = vsel %vm2015_vm12, %v1973_v43, %v2031_v36 }
 0x66d   : > { %v2059_v52 = vpack.c.bf16 %v2047_v50, %v2046_v49  ;;  %v2045_v53 = vsel %vm2013_vm13, %v1965_v46, %v2029_v48 }
 0x66e   : > { %v2058_v54 = vpack.c.bf16 %v2045_v53, %v2044_v51 }
 0x670   : > { %2601 = vmatmul.mubr.msk.bf16.gmra.mrb[60].mxu1 %vm892_vm0, %v2058_v54 }
 0x671   : > { %2186 = vmatprep.mubr.bf16.mxu1 %v3069_v16 }
 0x675   : > { %v2920_v55 = vpop.f32.mrb[68].mxu0 }
 0x676   : > { %v1986_v56 = vadd.f32 %v2920_v55, %v3447_v6  ;;  %v1977_v35 = vpop.f32.mrb[69].mxu0 }
 0x677   : > { %v1978_v47 = vadd.f32 %v3447_v6, %v1977_v35  ;;  %v2921_v58 = vpop.f32.mrb[70].mxu0 }
 0x678   : > { %v2034_v59 = vmul.f32 0.01, %v1986_v56  ;;  %v1989_v60 = vadd.f32 %v2921_v58, %v3447_v6  ;;  %v1980_v61 = vpop.f32.mrb[71].mxu0  ;;  %2602 = vmatmul.mubr.msk.bf16.gmra.mrb[64].mxu1 %vm892_vm0, %v2059_v52  ;;  %vm2018_vm14 = vcmp.ge.f32.partialorder %v1986_v56, 0.0 }
 0x679   : > { %v2032_v62 = vmul.f32 0.01, %v1978_v47  ;;  %v1981_v63 = vadd.f32 %v3447_v6, %v1980_v61  ;;  %2196 = vmatprep.mubr.bf16.mxu1 %v3069_v16  ;;  %vm2016_vm15 = vcmp.ge.f32.partialorder %v1978_v47, 0.0 }
 0x67a   : > { %vm2019_vm1 = vcmp.ge.f32.partialorder %v1989_v60, 0.0  ;;  %v2035_v0 = vmul.f32 0.01, %v1989_v60  ;;  %v2050_v2 = vsel %vm2018_vm14, %v1986_v56, %v2034_v59 }
 0x67b   : > { %vm2017_vm2 = vcmp.ge.f32.partialorder %v1981_v63, 0.0  ;;  %v2033_v1 = vmul.f32 0.01, %v1981_v63  ;;  %v2048_v57 = vsel %vm2016_vm15, %v1978_v47, %v2032_v62 }
 0x67c   : > { %v2051_v3 = vsel %vm2019_vm1, %v1989_v60, %v2035_v0 }
 0x67d   : > { %v2061_v4 = vpack.c.bf16 %v2051_v3, %v2050_v2  ;;  %v2049_v5 = vsel %vm2017_vm2, %v1981_v63, %v2033_v1 }
 0x67e   : > { %v2060_v7 = vpack.c.bf16 %v2049_v5, %v2048_v57 }
 0x680   : > { %2603 = vmatmul.mubr.msk.bf16.gmra.mrb[68].mxu1 %vm892_vm0, %v2060_v7 }
 0x681   : > { %2206 = vmatprep.mubr.bf16.mxu1 %v3069_v16 }
 0x685   : > { %v2924_v8 = vpop.f32.mrb[72].mxu0 }
 0x686   : > { %v2002_v9 = vadd.f32 %v2924_v8, %v3447_v6  ;;  %v1993_v10 = vpop.f32.mrb[73].mxu0 }
 0x687   : > { %v1994_v11 = vadd.f32 %v3447_v6, %v1993_v10  ;;  %v2925_v12 = vpop.f32.mrb[74].mxu0 }
 0x688   : > { %v2038_v13 = vmul.f32 0.01, %v2002_v9  ;;  %v2005_v14 = vadd.f32 %v2925_v12, %v3447_v6  ;;  %v1996_v15 = vpop.f32.mrb[75].mxu0  ;;  %2604 = vmatmul.mubr.msk.bf16.gmra.mrb[72].mxu1 %vm892_vm0, %v2061_v4  ;;  %vm2022_vm3 = vcmp.ge.f32.partialorder %v2002_v9, 0.0 }
 0x689   : > { %v2036_v17 = vmul.f32 0.01, %v1994_v11  ;;  %v1997_v18 = vadd.f32 %v3447_v6, %v1996_v15  ;;  %2216 = vmatprep.mubr.bf16.mxu1 %v3069_v16  ;;  %vm2020_vm4 = vcmp.ge.f32.partialorder %v1994_v11, 0.0  ;;  %v2070_v6 = vlaneseq }
 0x68a   : > { %vm2023_vm5 = vcmp.ge.f32.partialorder %v2005_v14, 0.0  ;;  %v2039_v19 = vmul.f32 0.01, %v2005_v14  ;;  %v2054_v21 = vsel %vm2022_vm3, %v2002_v9, %v2038_v13 }
 0x68b   : > { %vm2021_vm6 = vcmp.ge.f32.partialorder %v1997_v18, 0.0  ;;  %v2037_v20 = vmul.f32 0.01, %v1997_v18  ;;  %v2052_v24 = vsel %vm2020_vm4, %v1994_v11, %v2036_v17  ;;  %v2071_v28 = vshrl.u32 %v2070_v6, 7 }
 0x68c   : > { %v2055_v22 = vsel %vm2023_vm5, %v2005_v14, %v2039_v19 }
 0x68d   : > { %v2063_v25 = vpack.c.bf16 %v2055_v22, %v2054_v21  ;;  %v2053_v26 = vsel %vm2021_vm6, %v1997_v18, %v2037_v20  ;;  %v2072_v29 = vsub.s32 0, %v2071_v28  ;;  %v2076_v31 = vsub.s32 1, %v2071_v28 }
 0x68e   : > { %v2062_v27 = vpack.c.bf16 %v2053_v26, %v2052_v24 }
 0x68f   : > { %v3483_v32 = vrot.slane %v2068_v30, %v2072_v29  ;;  %v3485_v33 = vrot.slane %v2068_v30, %v2076_v31 }
 0x690   : > { %2605 = vmatmul.mubr.msk.bf16.gmra.mrb[76].mxu1 %vm892_vm0, %v2062_v27 }
 0x691   : > { %2226 = vmatprep.mubr.bf16.mxu1 %v3069_v16 }
 0x698   : > { %2606 = vmatmul.mubr.msk.bf16.gmra.mrb[80].mxu1 %vm892_vm0, %v2063_v25 }
 0x733   : > { %v2158_v34 = vpop.f32.mrb[52].mxu1 }
 0x734   : > { %v2159_v23 = vadd.f32 %v2158_v34, %v3483_v32  ;;  %v2160_v37 = vpop.f32.mrb[53].mxu1 }
 0x735   : > { %v2161_v16 = vadd.f32 %v2160_v37, %v3485_v33  ;;  %v2162_v38 = vpop.f32.mrb[54].mxu1 }
 0x736   : > { %v2237_v39 = vmax.f32 %v2159_v23, 0.0  ;;  %v2163_v40 = vadd.f32 %v2162_v38, %v3483_v32  ;;  %v2164_v41 = vpop.f32.mrb[55].mxu1 }
 0x737   : > { %v2238_v42 = vmax.f32 %v2161_v16, 0.0  ;;  %v2165_v43 = vadd.f32 %v2164_v41, %v3485_v33 }
 0x738   : > { %v2239_v44 = vmax.f32 %v2163_v40, 0.0 }
 0x739   : > { %v2627_v45 = vpack.c.bf16 %v2238_v42, %v2237_v39  ;;  %v2240_v46 = vmax.f32 %v2165_v43, 0.0 }
 0x73b   : > { %2365 = vst [vmem:[%s3496_s21] sm:$0xff] %v2627_v45  ;;  %v2628_v36 = vpack.c.bf16 %v2240_v46, %v2239_v44  ;;  %v2168_v48 = vpop.f32.mrb[56].mxu1 }
 0x73c   : > { %v2169_v49 = vadd.f32 %v2168_v48, %v3483_v32  ;;  %v2170_v50 = vpop.f32.mrb[57].mxu1 }
 0x73d   : > { %2366 = vst [vmem:[%s3496_s21 + $0x8] sm:$0xff] %v2628_v36  ;;  %v2171_v51 = vadd.f32 %v2170_v50, %v3485_v33  ;;  %v2172_v52 = vpop.f32.mrb[58].mxu1 }
 0x73e   : > { %v2241_v53 = vmax.f32 %v2169_v49, 0.0  ;;  %v2173_v54 = vadd.f32 %v2172_v52, %v3483_v32  ;;  %v2174_v55 = vpop.f32.mrb[59].mxu1 }
 0x73f   : > { %v2242_v56 = vmax.f32 %v2171_v51, 0.0  ;;  %v2175_v35 = vadd.f32 %v2174_v55, %v3485_v33 }
 0x740   : > { %v2243_v47 = vmax.f32 %v2173_v54, 0.0 }
 0x741   : > { %v2629_v58 = vpack.c.bf16 %v2242_v56, %v2241_v53  ;;  %v2244_v59 = vmax.f32 %v2175_v35, 0.0 }
 0x743   : > { %2367 = vst [vmem:[%s3496_s21 + $0x10] sm:$0xff] %v2629_v58  ;;  %v2630_v60 = vpack.c.bf16 %v2244_v59, %v2243_v47  ;;  %v2178_v61 = vpop.f32.mrb[60].mxu1 }
 0x744   : > { %v2179_v62 = vadd.f32 %v2178_v61, %v3483_v32  ;;  %v2180_v63 = vpop.f32.mrb[61].mxu1 }
 0x745   : > { %2368 = vst [vmem:[%s3496_s21 + $0x18] sm:$0xff] %v2630_v60  ;;  %v2181_v0 = vadd.f32 %v2180_v63, %v3485_v33  ;;  %v2182_v1 = vpop.f32.mrb[62].mxu1 }
 0x746   : > { %v2245_v2 = vmax.f32 %v2179_v62, 0.0  ;;  %v2183_v3 = vadd.f32 %v2182_v1, %v3483_v32  ;;  %v2184_v57 = vpop.f32.mrb[63].mxu1 }
 0x747   : > { %v2246_v4 = vmax.f32 %v2181_v0, 0.0  ;;  %v2185_v5 = vadd.f32 %v2184_v57, %v3485_v33 }
 0x748   : > { %v2247_v7 = vmax.f32 %v2183_v3, 0.0 }
 0x749   : > { %v2631_v8 = vpack.c.bf16 %v2246_v4, %v2245_v2  ;;  %v2248_v9 = vmax.f32 %v2185_v5, 0.0 }
 0x74b   : > { %2369 = vst [vmem:[%s3496_s21 + $0x20] sm:$0xff] %v2631_v8  ;;  %v2632_v10 = vpack.c.bf16 %v2248_v9, %v2247_v7  ;;  %v2188_v11 = vpop.f32.mrb[64].mxu1 }
 0x74c   : > { %v2189_v12 = vadd.f32 %v2188_v11, %v3483_v32  ;;  %v2190_v13 = vpop.f32.mrb[65].mxu1 }
 0x74d   : > { %2370 = vst [vmem:[%s3496_s21 + $0x28] sm:$0xff] %v2632_v10  ;;  %v2191_v14 = vadd.f32 %v2190_v13, %v3485_v33  ;;  %v2192_v15 = vpop.f32.mrb[66].mxu1 }
 0x74e   : > { %v2249_v17 = vmax.f32 %v2189_v12, 0.0  ;;  %v2193_v18 = vadd.f32 %v2192_v15, %v3483_v32  ;;  %v2194_v19 = vpop.f32.mrb[67].mxu1 }
 0x74f   : > { %v2250_v20 = vmax.f32 %v2191_v14, 0.0  ;;  %v2195_v21 = vadd.f32 %v2194_v19, %v3485_v33 }
 0x750   : > { %v2251_v22 = vmax.f32 %v2193_v18, 0.0 }
 0x751   : > { %v2633_v24 = vpack.c.bf16 %v2250_v20, %v2249_v17  ;;  %v2252_v25 = vmax.f32 %v2195_v21, 0.0 }
 0x753   : > { %2371 = vst [vmem:[%s3496_s21 + $0x30] sm:$0xff] %v2633_v24  ;;  %v2634_v26 = vpack.c.bf16 %v2252_v25, %v2251_v22  ;;  %v2198_v27 = vpop.f32.mrb[68].mxu1 }
 0x754   : > { %v2199_v6 = vadd.f32 %v2198_v27, %v3483_v32  ;;  %v2200_v28 = vpop.f32.mrb[69].mxu1 }
 0x755   : > { %2372 = vst [vmem:[%s3496_s21 + $0x38] sm:$0xff] %v2634_v26  ;;  %v2201_v29 = vadd.f32 %v2200_v28, %v3485_v33  ;;  %v2202_v30 = vpop.f32.mrb[70].mxu1 }
 0x756   : > { %v2253_v31 = vmax.f32 %v2199_v6, 0.0  ;;  %v2203_v34 = vadd.f32 %v2202_v30, %v3483_v32  ;;  %v2204_v23 = vpop.f32.mrb[71].mxu1 }
 0x757   : > { %v2254_v37 = vmax.f32 %v2201_v29, 0.0  ;;  %v2205_v16 = vadd.f32 %v2204_v23, %v3485_v33 }
 0x758   : > { %v2255_v38 = vmax.f32 %v2203_v34, 0.0 }
 0x759   : > { %v2635_v39 = vpack.c.bf16 %v2254_v37, %v2253_v31  ;;  %v2256_v40 = vmax.f32 %v2205_v16, 0.0 }
 0x75b   : > { %2373 = vst [vmem:[%s3496_s21 + $0x40] sm:$0xff] %v2635_v39  ;;  %v2636_v41 = vpack.c.bf16 %v2256_v40, %v2255_v38  ;;  %v2208_v42 = vpop.f32.mrb[72].mxu1 }
 0x75c   : > { %v2209_v43 = vadd.f32 %v2208_v42, %v3483_v32  ;;  %v2210_v44 = vpop.f32.mrb[73].mxu1 }
 0x75d   : > { %2374 = vst [vmem:[%s3496_s21 + $0x48] sm:$0xff] %v2636_v41  ;;  %v2211_v45 = vadd.f32 %v2210_v44, %v3485_v33  ;;  %v2212_v46 = vpop.f32.mrb[74].mxu1 }
 0x75e   : > { %v2257_v36 = vmax.f32 %v2209_v43, 0.0  ;;  %v2213_v48 = vadd.f32 %v2212_v46, %v3483_v32  ;;  %v2214_v49 = vpop.f32.mrb[75].mxu1 }
 0x75f   : > { %v2258_v50 = vmax.f32 %v2211_v45, 0.0  ;;  %v2215_v51 = vadd.f32 %v2214_v49, %v3485_v33 }
 0x760   : > { %v2259_v52 = vmax.f32 %v2213_v48, 0.0 }
 0x761   : > { %v2637_v53 = vpack.c.bf16 %v2258_v50, %v2257_v36  ;;  %v2260_v54 = vmax.f32 %v2215_v51, 0.0 }
 0x763   : > { %2375 = vst [vmem:[%s3496_s21 + $0x50] sm:$0xff] %v2637_v53  ;;  %v2638_v55 = vpack.c.bf16 %v2260_v54, %v2259_v52  ;;  %v2218_v56 = vpop.f32.mrb[76].mxu1 }
 0x764   : > { %v2219_v35 = vadd.f32 %v2218_v56, %v3483_v32  ;;  %v2220_v47 = vpop.f32.mrb[77].mxu1 }
 0x765   : > { %2376 = vst [vmem:[%s3496_s21 + $0x58] sm:$0xff] %v2638_v55  ;;  %v2221_v58 = vadd.f32 %v2220_v47, %v3485_v33  ;;  %v2222_v59 = vpop.f32.mrb[78].mxu1 }
 0x766   : > { %v2261_v60 = vmax.f32 %v2219_v35, 0.0  ;;  %v2223_v61 = vadd.f32 %v2222_v59, %v3483_v32  ;;  %v2224_v62 = vpop.f32.mrb[79].mxu1 }
 0x767   : > { %v2262_v63 = vmax.f32 %v2221_v58, 0.0  ;;  %v2225_v0 = vadd.f32 %v2224_v62, %v3485_v33 }
 0x768   : > { %v2263_v1 = vmax.f32 %v2223_v61, 0.0 }
 0x769   : > { %v2639_v2 = vpack.c.bf16 %v2262_v63, %v2261_v60  ;;  %v2264_v3 = vmax.f32 %v2225_v0, 0.0 }
 0x76b   : > { %2377 = vst [vmem:[%s3496_s21 + $0x60] sm:$0xff] %v2639_v2  ;;  %v2640_v57 = vpack.c.bf16 %v2264_v3, %v2263_v1  ;;  %v2228_v4 = vpop.f32.mrb[80].mxu1 }
 0x76c   : > { %v2229_v5 = vadd.f32 %v2228_v4, %v3483_v32  ;;  %v2230_v7 = vpop.f32.mrb[81].mxu1 }
 0x76d   : > { %2378 = vst [vmem:[%s3496_s21 + $0x68] sm:$0xff] %v2640_v57  ;;  %v2231_v8 = vadd.f32 %v2230_v7, %v3485_v33  ;;  %v2232_v9 = vpop.f32.mrb[82].mxu1 }
 0x76e   : > { %v2265_v10 = vmax.f32 %v2229_v5, 0.0  ;;  %v2233_v11 = vadd.f32 %v2232_v9, %v3483_v32  ;;  %v2234_v12 = vpop.f32.mrb[83].mxu1 }
 0x76f   : > { %v2266_v13 = vmax.f32 %v2231_v8, 0.0  ;;  %v2235_v14 = vadd.f32 %v2234_v12, %v3485_v33 }
 0x770   : > { %v2267_v15 = vmax.f32 %v2233_v11, 0.0 }
 0x771   : > { %v2641_v17 = vpack.c.bf16 %v2266_v13, %v2265_v10  ;;  %v2268_v18 = vmax.f32 %v2235_v14, 0.0 }
 0x773   : > { %2379 = vst [vmem:[%s3496_s21 + $0x70] sm:$0xff] %v2641_v17  ;;  %v2642_v19 = vpack.c.bf16 %v2268_v18, %v2267_v15 }
 0x775   : > { %2380 = vst [vmem:[%s3496_s21 + $0x78] sm:$0xff] %v2642_v19 }
 0x776 PF: > { %s20_s13 = sadd.s32 1, %s3067_s13  }
 0x777   : > { %p17_p4 = scmp.ge.s32.totalorder %s20_s13, 4  }
 0x779   :  { %19 = sbr.rel (!%p17_p4) target bundleno = 1 (0x1), region = 97 }

</bundles_post_ra>
